<compile_context>
chip_gen: v6e
topology: v6e:2x2x1
jax: 0.10.0
libtpu: 0.0.40
codegen_flags: <defaults>
</compile_context>

<pallas_src>
import math
import jax
import jax.numpy as jnp
from jax.experimental import pallas as pl
from jax.experimental.pallas import tpu as pltpu


# ----------------------------- fused kernel ----------------------------------

def make_gdt_layer_kernel(num_heads, head_dim, hop_num, alpha):
    inv_sqrt_d = 1.0 / math.sqrt(head_dim)
    out_feats = num_heads * head_dim

    def kernel(feat_ref, adj_ref, login_ref, ln_g_ref, ln_b_ref, wqkv_ref,
               ffg_ref, ffb_ref, w1_ref, b1_ref, w2_ref, b2_ref, o_ref):
        feat = feat_ref[...].astype(jnp.float32)          # (N, F)
        adj = adj_ref[...]                                # (N, N)  adj[dst, src]
        log_in = login_ref[...]                           # (N, 1)  per-dst log-in-deg

        # ---- graph_layer_norm (feat_drop is a no-op in eval) ----
        mean = jnp.mean(feat, axis=-1, keepdims=True)
        var = jnp.mean(jnp.square(feat - mean), axis=-1, keepdims=True)
        x_ln = (feat - mean) * jax.lax.rsqrt(var + 1e-5)
        x_ln = x_ln * ln_g_ref[...] + ln_b_ref[...]

        # ---- fused fc_head / fc_tail / fc_ent projection (one MXU matmul) ----
        qkv = jnp.dot(x_ln, wqkv_ref[...], preferred_element_type=jnp.float32)
        k = qkv[:, 0 * out_feats:1 * out_feats]           # fc_head -> 'k' (src)
        q = qkv[:, 1 * out_feats:2 * out_feats]           # fc_tail -> 'q' (dst)
        v = qkv[:, 2 * out_feats:3 * out_feats]           # fc_ent  -> 'v' (src)

        # e = u_dot_v(k, q); e = e * log_in(dst); e = e / sqrt(head_dim)
        # -> fold the dst-side scale into q once for all heads.
        q = q * (log_in * inv_sqrt_d)

        # ---- per-head edge_softmax + PPR diffusion (heads statically unrolled) ----
        head_outs = []
        for h in range(num_heads):
            sl = slice(h * head_dim, (h + 1) * head_dim)
            q_h, k_h, v_h = q[:, sl], k[:, sl], v[:, sl]   # (N, Dh)

            # scores s[dst, src], contraction over Dh without an explicit k.T
            s = jax.lax.dot_general(q_h, k_h, (((1,), (1,)), ((), ())),
                                    preferred_element_type=jnp.float32)

            # edge_softmax over incoming edges of each dst node.
            # Single masking pass: m >= masked max so exp args <= 0 (no overflow);
            # multiplying by adj zeroes non-edges, identical result after norm.
            m = jnp.max(s, axis=-1, keepdims=True)
            p = jnp.exp(s - m) * adj
            den = jnp.maximum(jnp.sum(p, axis=-1, keepdims=True), 1e-30)
            a = p * pl.reciprocal(den, approx=False)       # row-stochastic (on edges)

            # ppr_estimation: feat_0 = v; feat = (1-alpha) * (A @ feat) + alpha * feat_0
            feat0 = v_h
            fh = feat0
            for _ in range(hop_num):
                msg = jnp.dot(a, fh, preferred_element_type=jnp.float32)
                fh = (1.0 - alpha) * msg + alpha * feat0
            head_outs.append(fh)

        ppr = jnp.concatenate(head_outs, axis=-1)          # (N, H*Dh) == .flatten(1)

        # ---- residual (res_fc = Identity, graph_a_i = graph_b_i = 1.0) ----
        rst = ppr + feat

        # ---- ff_layer_norm ----
        mean2 = jnp.mean(rst, axis=-1, keepdims=True)
        var2 = jnp.mean(jnp.square(rst - mean2), axis=-1, keepdims=True)
        xn = (rst - mean2) * jax.lax.rsqrt(var2 + 1e-5)
        xn = xn * ffg_ref[...] + ffb_ref[...]

        # ---- PositionWiseFeedForward: w2(relu(w1(x)))  (dropout off in eval) ----
        h1 = jnp.maximum(
            jnp.dot(xn, w1_ref[...], preferred_element_type=jnp.float32) + b1_ref[...],
            0.0)
        ff = jnp.dot(h1, w2_ref[...], preferred_element_type=jnp.float32) + b2_ref[...]

        # rst = ff_b_i * ff_rst + ff_a_i * rst  (both = 1.0)
        o_ref[...] = ff + rst

    return kernel


# ----------------------------- wrapper ----------------------------------------

def gdt_layer_v2_forward(feat, adj, log_in, params, *,
                         num_heads, head_dim, hop_num, alpha):
    """GDTLayerV2 forward (eval mode, concat=False, residual=True, ppr_diff=True)."""
    N, F = feat.shape
    out_feats = num_heads * head_dim
    assert F == out_feats, "this config uses Identity res_fc (in_feats == out_feats)"
    hidden = params["w1"].shape[1]

    # Fuse the three projection weights into one (F, 3*out_feats) matrix:
    # column blocks = [fc_head | fc_tail | fc_ent].
    w_qkv = jnp.concatenate(
        [params["w_head"], params["w_tail"], params["w_ent"]], axis=1)

    def fullspec(shape):
        nd = len(shape)
        return pl.BlockSpec(shape, lambda i, _nd=nd: (0,) * _nd)

    kernel = make_gdt_layer_kernel(num_heads, head_dim, hop_num, alpha)

    return pl.pallas_call(
        kernel,
        out_shape=jax.ShapeDtypeStruct((N, out_feats), jnp.float32),
        grid=(1,),
        in_specs=[
            fullspec((N, F)),                 # feat
            fullspec((N, N)),                 # adj
            fullspec((N, 1)),                 # log_in
            fullspec((1, F)),                 # graph_layer_norm gamma
            fullspec((1, F)),                 # graph_layer_norm beta
            fullspec((F, 3 * out_feats)),     # fused qkv weight
            fullspec((1, out_feats)),         # ff_layer_norm gamma
            fullspec((1, out_feats)),         # ff_layer_norm beta
            fullspec((out_feats, hidden)),    # FFN w1
            fullspec((1, hidden)),            # FFN b1
            fullspec((hidden, out_feats)),    # FFN w2
            fullspec((1, out_feats)),         # FFN b2
        ],
        out_specs=fullspec((N, out_feats)),
        compiler_params=pltpu.CompilerParams(
            dimension_semantics=("arbitrary",)),
    )(feat, adj, log_in,
      params["ln_g"], params["ln_b"], w_qkv,
      params["ff_ln_g"], params["ff_ln_b"],
      params["w1"], params["b1"], params["w2"], params["b2"])


# ----------------------------- main -------------------------------------------

if __name__ == "__main__":
    N = 16                 # number of graph nodes
    IN_FEATS = 32          # in_ent_feats
    OUT_FEATS = 32         # out_ent_feats
    NUM_HEADS = 4
    HEAD_DIM = OUT_FEATS // NUM_HEADS
    HOP_NUM = 5
    ALPHA = 0.1
    FF_HIDDEN = 4 * OUT_FEATS

    key = jax.random.PRNGKey(0)
    k_feat, k_h, k_t, k_e, k_w1, k_w2 = jax.random.split(key, 6)

    feat = jax.random.normal(k_feat, (N, IN_FEATS), dtype=jnp.float32)

    # Deterministic graph: self-loops + bidirectional ring => in_degree = 3 everywhere.
    idx = jnp.arange(N)
    adj = jnp.zeros((N, N), jnp.float32)
    adj = adj.at[idx, idx].set(1.0)
    adj = adj.at[idx, (idx + 1) % N].set(1.0)
    adj = adj.at[idx, (idx - 1) % N].set(1.0)
    in_deg = jnp.sum(adj, axis=-1, keepdims=True)           # (N, 1)
    # TODO(synk): 'log_in' node feature is external graph data in the original
    # module; assume log_in = log(in_degree) per destination node.
    log_in = jnp.log(in_deg)

    # xavier_normal-style deterministic init with small_init_gain/sqrt(layer_num)
    gain = (2.0 / math.sqrt(IN_FEATS + 4.0 * OUT_FEATS)) / math.sqrt(1.0)

    def xavier(k, fan_in, fan_out):
        std = gain * math.sqrt(2.0 / (fan_in + fan_out))
        return std * jax.random.normal(k, (fan_in, fan_out), dtype=jnp.float32)

    params = {
        "ln_g": jnp.ones((1, IN_FEATS), jnp.float32),
        "ln_b": jnp.zeros((1, IN_FEATS), jnp.float32),
        "w_head": xavier(k_h, IN_FEATS, OUT_FEATS),
        "w_tail": xavier(k_t, IN_FEATS, OUT_FEATS),
        "w_ent": xavier(k_e, IN_FEATS, OUT_FEATS),
        "ff_ln_g": jnp.ones((1, OUT_FEATS), jnp.float32),
        "ff_ln_b": jnp.zeros((1, OUT_FEATS), jnp.float32),
        "w1": 0.05 * jax.random.normal(k_w1, (OUT_FEATS, FF_HIDDEN), jnp.float32),
        "b1": jnp.zeros((1, FF_HIDDEN), jnp.float32),
        "w2": 0.05 * jax.random.normal(k_w2, (FF_HIDDEN, OUT_FEATS), jnp.float32),
        "b2": jnp.zeros((1, OUT_FEATS), jnp.float32),
    }

    out = gdt_layer_v2_forward(feat, adj, log_in, params,
                               num_heads=NUM_HEADS, head_dim=HEAD_DIM,
                               hop_num=HOP_NUM, alpha=ALPHA)
    out = jax.block_until_ready(out)
    assert out.shape == (N, OUT_FEATS)
    assert bool(jnp.all(jnp.isfinite(out)))
    print("KERNEL_OK")
</pallas_src>

<mosaic_0001>
module attributes {stable_mosaic.version = 11 : i64} {
  func.func @kernel(%arg0: i32, %arg1: memref<16x32xf32, #tpu.memory_space<vmem>>, %arg2: memref<16x16xf32, #tpu.memory_space<vmem>>, %arg3: memref<16x1xf32, #tpu.memory_space<vmem>>, %arg4: memref<1x32xf32, #tpu.memory_space<vmem>>, %arg5: memref<1x32xf32, #tpu.memory_space<vmem>>, %arg6: memref<32x96xf32, #tpu.memory_space<vmem>>, %arg7: memref<1x32xf32, #tpu.memory_space<vmem>>, %arg8: memref<1x32xf32, #tpu.memory_space<vmem>>, %arg9: memref<32x128xf32, #tpu.memory_space<vmem>>, %arg10: memref<1x128xf32, #tpu.memory_space<vmem>>, %arg11: memref<128x32xf32, #tpu.memory_space<vmem>>, %arg12: memref<1x32xf32, #tpu.memory_space<vmem>>, %arg13: memref<16x32xf32, #tpu.memory_space<vmem>>) attributes {dimension_semantics = [#tpu.dimension_semantics<arbitrary>], iteration_bounds = array<i64: 1>, scalar_prefetch = 0 : i64, scratch_operands = 0 : i64, tpu.core_type = #tpu.core_type<tc>, window_params = [{pipeline_mode = #tpu.pipeline_mode<synchronous>, transform_indices = @transform_0, window_bounds = array<i64: 16, 32>}, {pipeline_mode = #tpu.pipeline_mode<synchronous>, transform_indices = @transform_1, window_bounds = array<i64: 16, 16>}, {pipeline_mode = #tpu.pipeline_mode<synchronous>, transform_indices = @transform_2, window_bounds = array<i64: 16, 1>}, {pipeline_mode = #tpu.pipeline_mode<synchronous>, transform_indices = @transform_3, window_bounds = array<i64: 1, 32>}, {pipeline_mode = #tpu.pipeline_mode<synchronous>, transform_indices = @transform_4, window_bounds = array<i64: 1, 32>}, {pipeline_mode = #tpu.pipeline_mode<synchronous>, transform_indices = @transform_5, window_bounds = array<i64: 32, 96>}, {pipeline_mode = #tpu.pipeline_mode<synchronous>, transform_indices = @transform_6, window_bounds = array<i64: 1, 32>}, {pipeline_mode = #tpu.pipeline_mode<synchronous>, transform_indices = @transform_7, window_bounds = array<i64: 1, 32>}, {pipeline_mode = #tpu.pipeline_mode<synchronous>, transform_indices = @transform_8, window_bounds = array<i64: 32, 128>}, {pipeline_mode = #tpu.pipeline_mode<synchronous>, transform_indices = @transform_9, window_bounds = array<i64: 1, 128>}, {pipeline_mode = #tpu.pipeline_mode<synchronous>, transform_indices = @transform_10, window_bounds = array<i64: 128, 32>}, {pipeline_mode = #tpu.pipeline_mode<synchronous>, transform_indices = @transform_11, window_bounds = array<i64: 1, 32>}, {pipeline_mode = #tpu.pipeline_mode<synchronous>, transform_indices = @transform_12, window_bounds = array<i64: 16, 32>}]} {
    %c0 = arith.constant 0 : index
    %c0_0 = arith.constant 0 : index
    %0 = vector.load %arg1[%c0, %c0_0] : memref<16x32xf32, #tpu.memory_space<vmem>>, vector<16x32xf32>
    %c0_1 = arith.constant 0 : index
    %c0_2 = arith.constant 0 : index
    %1 = vector.load %arg2[%c0_1, %c0_2] : memref<16x16xf32, #tpu.memory_space<vmem>>, vector<16x16xf32>
    %c0_3 = arith.constant 0 : index
    %c0_4 = arith.constant 0 : index
    %2 = vector.load %arg3[%c0_3, %c0_4] : memref<16x1xf32, #tpu.memory_space<vmem>>, vector<16x1xf32>
    %cst = arith.constant dense<0.000000e+00> : vector<16xf32>
    %3 = vector.multi_reduction <add>, %0, %cst [1] : vector<16x32xf32> to vector<16xf32>
    %4 = vector.shape_cast %3 : vector<16xf32> to vector<16x1xf32>
    %cst_5 = arith.constant 3.200000e+01 : f32
    %5 = vector.broadcast %cst_5 : f32 to vector<16x1xf32>
    %6 = arith.divf %4, %5 : vector<16x1xf32>
    %7 = vector.broadcast %6 : vector<16x1xf32> to vector<16x32xf32>
    %8 = arith.subf %0, %7 : vector<16x32xf32>
    %9 = arith.mulf %8, %8 : vector<16x32xf32>
    %cst_6 = arith.constant dense<0.000000e+00> : vector<16xf32>
    %10 = vector.multi_reduction <add>, %9, %cst_6 [1] : vector<16x32xf32> to vector<16xf32>
    %11 = vector.shape_cast %10 : vector<16xf32> to vector<16x1xf32>
    %cst_7 = arith.constant 3.200000e+01 : f32
    %12 = vector.broadcast %cst_7 : f32 to vector<16x1xf32>
    %13 = arith.divf %11, %12 : vector<16x1xf32>
    %14 = vector.broadcast %6 : vector<16x1xf32> to vector<16x32xf32>
    %15 = arith.subf %0, %14 : vector<16x32xf32>
    %cst_8 = arith.constant 9.99999974E-6 : f32
    %16 = vector.broadcast %cst_8 : f32 to vector<16x1xf32>
    %17 = arith.addf %13, %16 : vector<16x1xf32>
    %18 = math.rsqrt %17 : vector<16x1xf32>
    %19 = vector.broadcast %18 : vector<16x1xf32> to vector<16x32xf32>
    %20 = arith.mulf %15, %19 : vector<16x32xf32>
    %c0_9 = arith.constant 0 : index
    %c0_10 = arith.constant 0 : index
    %21 = vector.load %arg4[%c0_9, %c0_10] : memref<1x32xf32, #tpu.memory_space<vmem>>, vector<1x32xf32>
    %22 = vector.broadcast %21 : vector<1x32xf32> to vector<16x32xf32>
    %23 = arith.mulf %20, %22 : vector<16x32xf32>
    %c0_11 = arith.constant 0 : index
    %c0_12 = arith.constant 0 : index
    %24 = vector.load %arg5[%c0_11, %c0_12] : memref<1x32xf32, #tpu.memory_space<vmem>>, vector<1x32xf32>
    %25 = vector.broadcast %24 : vector<1x32xf32> to vector<16x32xf32>
    %26 = arith.addf %23, %25 : vector<16x32xf32>
    %c0_13 = arith.constant 0 : index
    %c0_14 = arith.constant 0 : index
    %27 = vector.load %arg6[%c0_13, %c0_14] : memref<32x96xf32, #tpu.memory_space<vmem>>, vector<32x96xf32>
    %cst_15 = arith.constant dense<0.000000e+00> : vector<16x96xf32>
    %28 = tpu.matmul %26, %27, %cst_15 {dimension_numbers = #tpu.dot_dimension_numbers<[1], [0], [0], [1], [0, 0, 1, 1], [], []>} : vector<16x32xf32>, vector<32x96xf32>, vector<16x96xf32> -> vector<16x96xf32>
    %29 = vector.extract_strided_slice %28 {offsets = [0, 0], sizes = [16, 32], strides = [1, 1]} : vector<16x96xf32> to vector<16x32xf32>
    %30 = vector.extract_strided_slice %28 {offsets = [0, 32], sizes = [16, 32], strides = [1, 1]} : vector<16x96xf32> to vector<16x32xf32>
    %31 = vector.extract_strided_slice %28 {offsets = [0, 64], sizes = [16, 32], strides = [1, 1]} : vector<16x96xf32> to vector<16x32xf32>
    %cst_16 = arith.constant 0.353553385 : f32
    %32 = vector.broadcast %cst_16 : f32 to vector<16x1xf32>
    %33 = arith.mulf %2, %32 : vector<16x1xf32>
    %34 = vector.broadcast %33 : vector<16x1xf32> to vector<16x32xf32>
    %35 = arith.mulf %30, %34 : vector<16x32xf32>
    %36 = vector.extract_strided_slice %35 {offsets = [0, 0], sizes = [16, 8], strides = [1, 1]} : vector<16x32xf32> to vector<16x8xf32>
    %37 = vector.extract_strided_slice %29 {offsets = [0, 0], sizes = [16, 8], strides = [1, 1]} : vector<16x32xf32> to vector<16x8xf32>
    %38 = vector.extract_strided_slice %31 {offsets = [0, 0], sizes = [16, 8], strides = [1, 1]} : vector<16x32xf32> to vector<16x8xf32>
    %cst_17 = arith.constant dense<0.000000e+00> : vector<16x16xf32>
    %39 = tpu.matmul %36, %37, %cst_17 {dimension_numbers = #tpu.dot_dimension_numbers<[1], [1], [0], [0], [0, 0, 1, 0], [], []>} : vector<16x8xf32>, vector<16x8xf32>, vector<16x16xf32> -> vector<16x16xf32>
    %cst_18 = arith.constant dense<0xFF800000> : vector<16xf32>
    %40 = vector.multi_reduction <maximumf>, %39, %cst_18 [1] : vector<16x16xf32> to vector<16xf32>
    %41 = vector.shape_cast %40 : vector<16xf32> to vector<16x1xf32>
    %42 = vector.broadcast %41 : vector<16x1xf32> to vector<16x16xf32>
    %43 = arith.subf %39, %42 : vector<16x16xf32>
    %44 = math.exp %43 : vector<16x16xf32>
    %45 = arith.mulf %44, %1 : vector<16x16xf32>
    %cst_19 = arith.constant dense<0.000000e+00> : vector<16xf32>
    %46 = vector.multi_reduction <add>, %45, %cst_19 [1] : vector<16x16xf32> to vector<16xf32>
    %47 = vector.shape_cast %46 : vector<16xf32> to vector<16x1xf32>
    %cst_20 = arith.constant 1.000000e-30 : f32
    %48 = vector.broadcast %cst_20 : f32 to vector<16x1xf32>
    %49 = arith.maximumf %47, %48 : vector<16x1xf32>
    %50 = tpu.reciprocal %49 : vector<16x1xf32> -> vector<16x1xf32>
    %51 = vector.broadcast %50 : vector<16x1xf32> to vector<16x16xf32>
    %52 = arith.mulf %45, %51 : vector<16x16xf32>
    %cst_21 = arith.constant dense<0.000000e+00> : vector<16x8xf32>
    %53 = tpu.matmul %52, %38, %cst_21 {dimension_numbers = #tpu.dot_dimension_numbers<[1], [0], [0], [1], [0, 0, 1, 1], [], []>} : vector<16x16xf32>, vector<16x8xf32>, vector<16x8xf32> -> vector<16x8xf32>
    %cst_22 = arith.constant 0.899999976 : f32
    %54 = vector.broadcast %cst_22 : f32 to vector<16x8xf32>
    %55 = arith.mulf %54, %53 : vector<16x8xf32>
    %cst_23 = arith.constant 1.000000e-01 : f32
    %56 = vector.broadcast %cst_23 : f32 to vector<16x8xf32>
    %57 = arith.mulf %56, %38 : vector<16x8xf32>
    %58 = arith.addf %55, %57 : vector<16x8xf32>
    %cst_24 = arith.constant dense<0.000000e+00> : vector<16x8xf32>
    %59 = tpu.matmul %52, %58, %cst_24 {dimension_numbers = #tpu.dot_dimension_numbers<[1], [0], [0], [1], [0, 0, 1, 1], [], []>} : vector<16x16xf32>, vector<16x8xf32>, vector<16x8xf32> -> vector<16x8xf32>
    %cst_25 = arith.constant 0.899999976 : f32
    %60 = vector.broadcast %cst_25 : f32 to vector<16x8xf32>
    %61 = arith.mulf %60, %59 : vector<16x8xf32>
    %cst_26 = arith.constant 1.000000e-01 : f32
    %62 = vector.broadcast %cst_26 : f32 to vector<16x8xf32>
    %63 = arith.mulf %62, %38 : vector<16x8xf32>
    %64 = arith.addf %61, %63 : vector<16x8xf32>
    %cst_27 = arith.constant dense<0.000000e+00> : vector<16x8xf32>
    %65 = tpu.matmul %52, %64, %cst_27 {dimension_numbers = #tpu.dot_dimension_numbers<[1], [0], [0], [1], [0, 0, 1, 1], [], []>} : vector<16x16xf32>, vector<16x8xf32>, vector<16x8xf32> -> vector<16x8xf32>
    %cst_28 = arith.constant 0.899999976 : f32
    %66 = vector.broadcast %cst_28 : f32 to vector<16x8xf32>
    %67 = arith.mulf %66, %65 : vector<16x8xf32>
    %cst_29 = arith.constant 1.000000e-01 : f32
    %68 = vector.broadcast %cst_29 : f32 to vector<16x8xf32>
    %69 = arith.mulf %68, %38 : vector<16x8xf32>
    %70 = arith.addf %67, %69 : vector<16x8xf32>
    %cst_30 = arith.constant dense<0.000000e+00> : vector<16x8xf32>
    %71 = tpu.matmul %52, %70, %cst_30 {dimension_numbers = #tpu.dot_dimension_numbers<[1], [0], [0], [1], [0, 0, 1, 1], [], []>} : vector<16x16xf32>, vector<16x8xf32>, vector<16x8xf32> -> vector<16x8xf32>
    %cst_31 = arith.constant 0.899999976 : f32
    %72 = vector.broadcast %cst_31 : f32 to vector<16x8xf32>
    %73 = arith.mulf %72, %71 : vector<16x8xf32>
    %cst_32 = arith.constant 1.000000e-01 : f32
    %74 = vector.broadcast %cst_32 : f32 to vector<16x8xf32>
    %75 = arith.mulf %74, %38 : vector<16x8xf32>
    %76 = arith.addf %73, %75 : vector<16x8xf32>
    %cst_33 = arith.constant dense<0.000000e+00> : vector<16x8xf32>
    %77 = tpu.matmul %52, %76, %cst_33 {dimension_numbers = #tpu.dot_dimension_numbers<[1], [0], [0], [1], [0, 0, 1, 1], [], []>} : vector<16x16xf32>, vector<16x8xf32>, vector<16x8xf32> -> vector<16x8xf32>
    %cst_34 = arith.constant 0.899999976 : f32
    %78 = vector.broadcast %cst_34 : f32 to vector<16x8xf32>
    %79 = arith.mulf %78, %77 : vector<16x8xf32>
    %cst_35 = arith.constant 1.000000e-01 : f32
    %80 = vector.broadcast %cst_35 : f32 to vector<16x8xf32>
    %81 = arith.mulf %80, %38 : vector<16x8xf32>
    %82 = arith.addf %79, %81 : vector<16x8xf32>
    %83 = vector.extract_strided_slice %35 {offsets = [0, 8], sizes = [16, 8], strides = [1, 1]} : vector<16x32xf32> to vector<16x8xf32>
    %84 = vector.extract_strided_slice %29 {offsets = [0, 8], sizes = [16, 8], strides = [1, 1]} : vector<16x32xf32> to vector<16x8xf32>
    %85 = vector.extract_strided_slice %31 {offsets = [0, 8], sizes = [16, 8], strides = [1, 1]} : vector<16x32xf32> to vector<16x8xf32>
    %cst_36 = arith.constant dense<0.000000e+00> : vector<16x16xf32>
    %86 = tpu.matmul %83, %84, %cst_36 {dimension_numbers = #tpu.dot_dimension_numbers<[1], [1], [0], [0], [0, 0, 1, 0], [], []>} : vector<16x8xf32>, vector<16x8xf32>, vector<16x16xf32> -> vector<16x16xf32>
    %cst_37 = arith.constant dense<0xFF800000> : vector<16xf32>
    %87 = vector.multi_reduction <maximumf>, %86, %cst_37 [1] : vector<16x16xf32> to vector<16xf32>
    %88 = vector.shape_cast %87 : vector<16xf32> to vector<16x1xf32>
    %89 = vector.broadcast %88 : vector<16x1xf32> to vector<16x16xf32>
    %90 = arith.subf %86, %89 : vector<16x16xf32>
    %91 = math.exp %90 : vector<16x16xf32>
    %92 = arith.mulf %91, %1 : vector<16x16xf32>
    %cst_38 = arith.constant dense<0.000000e+00> : vector<16xf32>
    %93 = vector.multi_reduction <add>, %92, %cst_38 [1] : vector<16x16xf32> to vector<16xf32>
    %94 = vector.shape_cast %93 : vector<16xf32> to vector<16x1xf32>
    %cst_39 = arith.constant 1.000000e-30 : f32
    %95 = vector.broadcast %cst_39 : f32 to vector<16x1xf32>
    %96 = arith.maximumf %94, %95 : vector<16x1xf32>
    %97 = tpu.reciprocal %96 : vector<16x1xf32> -> vector<16x1xf32>
    %98 = vector.broadcast %97 : vector<16x1xf32> to vector<16x16xf32>
    %99 = arith.mulf %92, %98 : vector<16x16xf32>
    %cst_40 = arith.constant dense<0.000000e+00> : vector<16x8xf32>
    %100 = tpu.matmul %99, %85, %cst_40 {dimension_numbers = #tpu.dot_dimension_numbers<[1], [0], [0], [1], [0, 0, 1, 1], [], []>} : vector<16x16xf32>, vector<16x8xf32>, vector<16x8xf32> -> vector<16x8xf32>
    %cst_41 = arith.constant 0.899999976 : f32
    %101 = vector.broadcast %cst_41 : f32 to vector<16x8xf32>
    %102 = arith.mulf %101, %100 : vector<16x8xf32>
    %cst_42 = arith.constant 1.000000e-01 : f32
    %103 = vector.broadcast %cst_42 : f32 to vector<16x8xf32>
    %104 = arith.mulf %103, %85 : vector<16x8xf32>
    %105 = arith.addf %102, %104 : vector<16x8xf32>
    %cst_43 = arith.constant dense<0.000000e+00> : vector<16x8xf32>
    %106 = tpu.matmul %99, %105, %cst_43 {dimension_numbers = #tpu.dot_dimension_numbers<[1], [0], [0], [1], [0, 0, 1, 1], [], []>} : vector<16x16xf32>, vector<16x8xf32>, vector<16x8xf32> -> vector<16x8xf32>
    %cst_44 = arith.constant 0.899999976 : f32
    %107 = vector.broadcast %cst_44 : f32 to vector<16x8xf32>
    %108 = arith.mulf %107, %106 : vector<16x8xf32>
    %cst_45 = arith.constant 1.000000e-01 : f32
    %109 = vector.broadcast %cst_45 : f32 to vector<16x8xf32>
    %110 = arith.mulf %109, %85 : vector<16x8xf32>
    %111 = arith.addf %108, %110 : vector<16x8xf32>
    %cst_46 = arith.constant dense<0.000000e+00> : vector<16x8xf32>
    %112 = tpu.matmul %99, %111, %cst_46 {dimension_numbers = #tpu.dot_dimension_numbers<[1], [0], [0], [1], [0, 0, 1, 1], [], []>} : vector<16x16xf32>, vector<16x8xf32>, vector<16x8xf32> -> vector<16x8xf32>
    %cst_47 = arith.constant 0.899999976 : f32
    %113 = vector.broadcast %cst_47 : f32 to vector<16x8xf32>
    %114 = arith.mulf %113, %112 : vector<16x8xf32>
    %cst_48 = arith.constant 1.000000e-01 : f32
    %115 = vector.broadcast %cst_48 : f32 to vector<16x8xf32>
    %116 = arith.mulf %115, %85 : vector<16x8xf32>
    %117 = arith.addf %114, %116 : vector<16x8xf32>
    %cst_49 = arith.constant dense<0.000000e+00> : vector<16x8xf32>
    %118 = tpu.matmul %99, %117, %cst_49 {dimension_numbers = #tpu.dot_dimension_numbers<[1], [0], [0], [1], [0, 0, 1, 1], [], []>} : vector<16x16xf32>, vector<16x8xf32>, vector<16x8xf32> -> vector<16x8xf32>
    %cst_50 = arith.constant 0.899999976 : f32
    %119 = vector.broadcast %cst_50 : f32 to vector<16x8xf32>
    %120 = arith.mulf %119, %118 : vector<16x8xf32>
    %cst_51 = arith.constant 1.000000e-01 : f32
    %121 = vector.broadcast %cst_51 : f32 to vector<16x8xf32>
    %122 = arith.mulf %121, %85 : vector<16x8xf32>
    %123 = arith.addf %120, %122 : vector<16x8xf32>
    %cst_52 = arith.constant dense<0.000000e+00> : vector<16x8xf32>
    %124 = tpu.matmul %99, %123, %cst_52 {dimension_numbers = #tpu.dot_dimension_numbers<[1], [0], [0], [1], [0, 0, 1, 1], [], []>} : vector<16x16xf32>, vector<16x8xf32>, vector<16x8xf32> -> vector<16x8xf32>
    %cst_53 = arith.constant 0.899999976 : f32
    %125 = vector.broadcast %cst_53 : f32 to vector<16x8xf32>
    %126 = arith.mulf %125, %124 : vector<16x8xf32>
    %cst_54 = arith.constant 1.000000e-01 : f32
    %127 = vector.broadcast %cst_54 : f32 to vector<16x8xf32>
    %128 = arith.mulf %127, %85 : vector<16x8xf32>
    %129 = arith.addf %126, %128 : vector<16x8xf32>
    %130 = vector.extract_strided_slice %35 {offsets = [0, 16], sizes = [16, 8], strides = [1, 1]} : vector<16x32xf32> to vector<16x8xf32>
    %131 = vector.extract_strided_slice %29 {offsets = [0, 16], sizes = [16, 8], strides = [1, 1]} : vector<16x32xf32> to vector<16x8xf32>
    %132 = vector.extract_strided_slice %31 {offsets = [0, 16], sizes = [16, 8], strides = [1, 1]} : vector<16x32xf32> to vector<16x8xf32>
    %cst_55 = arith.constant dense<0.000000e+00> : vector<16x16xf32>
    %133 = tpu.matmul %130, %131, %cst_55 {dimension_numbers = #tpu.dot_dimension_numbers<[1], [1], [0], [0], [0, 0, 1, 0], [], []>} : vector<16x8xf32>, vector<16x8xf32>, vector<16x16xf32> -> vector<16x16xf32>
    %cst_56 = arith.constant dense<0xFF800000> : vector<16xf32>
    %134 = vector.multi_reduction <maximumf>, %133, %cst_56 [1] : vector<16x16xf32> to vector<16xf32>
    %135 = vector.shape_cast %134 : vector<16xf32> to vector<16x1xf32>
    %136 = vector.broadcast %135 : vector<16x1xf32> to vector<16x16xf32>
    %137 = arith.subf %133, %136 : vector<16x16xf32>
    %138 = math.exp %137 : vector<16x16xf32>
    %139 = arith.mulf %138, %1 : vector<16x16xf32>
    %cst_57 = arith.constant dense<0.000000e+00> : vector<16xf32>
    %140 = vector.multi_reduction <add>, %139, %cst_57 [1] : vector<16x16xf32> to vector<16xf32>
    %141 = vector.shape_cast %140 : vector<16xf32> to vector<16x1xf32>
    %cst_58 = arith.constant 1.000000e-30 : f32
    %142 = vector.broadcast %cst_58 : f32 to vector<16x1xf32>
    %143 = arith.maximumf %141, %142 : vector<16x1xf32>
    %144 = tpu.reciprocal %143 : vector<16x1xf32> -> vector<16x1xf32>
    %145 = vector.broadcast %144 : vector<16x1xf32> to vector<16x16xf32>
    %146 = arith.mulf %139, %145 : vector<16x16xf32>
    %cst_59 = arith.constant dense<0.000000e+00> : vector<16x8xf32>
    %147 = tpu.matmul %146, %132, %cst_59 {dimension_numbers = #tpu.dot_dimension_numbers<[1], [0], [0], [1], [0, 0, 1, 1], [], []>} : vector<16x16xf32>, vector<16x8xf32>, vector<16x8xf32> -> vector<16x8xf32>
    %cst_60 = arith.constant 0.899999976 : f32
    %148 = vector.broadcast %cst_60 : f32 to vector<16x8xf32>
    %149 = arith.mulf %148, %147 : vector<16x8xf32>
    %cst_61 = arith.constant 1.000000e-01 : f32
    %150 = vector.broadcast %cst_61 : f32 to vector<16x8xf32>
    %151 = arith.mulf %150, %132 : vector<16x8xf32>
    %152 = arith.addf %149, %151 : vector<16x8xf32>
    %cst_62 = arith.constant dense<0.000000e+00> : vector<16x8xf32>
    %153 = tpu.matmul %146, %152, %cst_62 {dimension_numbers = #tpu.dot_dimension_numbers<[1], [0], [0], [1], [0, 0, 1, 1], [], []>} : vector<16x16xf32>, vector<16x8xf32>, vector<16x8xf32> -> vector<16x8xf32>
    %cst_63 = arith.constant 0.899999976 : f32
    %154 = vector.broadcast %cst_63 : f32 to vector<16x8xf32>
    %155 = arith.mulf %154, %153 : vector<16x8xf32>
    %cst_64 = arith.constant 1.000000e-01 : f32
    %156 = vector.broadcast %cst_64 : f32 to vector<16x8xf32>
    %157 = arith.mulf %156, %132 : vector<16x8xf32>
    %158 = arith.addf %155, %157 : vector<16x8xf32>
    %cst_65 = arith.constant dense<0.000000e+00> : vector<16x8xf32>
    %159 = tpu.matmul %146, %158, %cst_65 {dimension_numbers = #tpu.dot_dimension_numbers<[1], [0], [0], [1], [0, 0, 1, 1], [], []>} : vector<16x16xf32>, vector<16x8xf32>, vector<16x8xf32> -> vector<16x8xf32>
    %cst_66 = arith.constant 0.899999976 : f32
    %160 = vector.broadcast %cst_66 : f32 to vector<16x8xf32>
    %161 = arith.mulf %160, %159 : vector<16x8xf32>
    %cst_67 = arith.constant 1.000000e-01 : f32
    %162 = vector.broadcast %cst_67 : f32 to vector<16x8xf32>
    %163 = arith.mulf %162, %132 : vector<16x8xf32>
    %164 = arith.addf %161, %163 : vector<16x8xf32>
    %cst_68 = arith.constant dense<0.000000e+00> : vector<16x8xf32>
    %165 = tpu.matmul %146, %164, %cst_68 {dimension_numbers = #tpu.dot_dimension_numbers<[1], [0], [0], [1], [0, 0, 1, 1], [], []>} : vector<16x16xf32>, vector<16x8xf32>, vector<16x8xf32> -> vector<16x8xf32>
    %cst_69 = arith.constant 0.899999976 : f32
    %166 = vector.broadcast %cst_69 : f32 to vector<16x8xf32>
    %167 = arith.mulf %166, %165 : vector<16x8xf32>
    %cst_70 = arith.constant 1.000000e-01 : f32
    %168 = vector.broadcast %cst_70 : f32 to vector<16x8xf32>
    %169 = arith.mulf %168, %132 : vector<16x8xf32>
    %170 = arith.addf %167, %169 : vector<16x8xf32>
    %cst_71 = arith.constant dense<0.000000e+00> : vector<16x8xf32>
    %171 = tpu.matmul %146, %170, %cst_71 {dimension_numbers = #tpu.dot_dimension_numbers<[1], [0], [0], [1], [0, 0, 1, 1], [], []>} : vector<16x16xf32>, vector<16x8xf32>, vector<16x8xf32> -> vector<16x8xf32>
    %cst_72 = arith.constant 0.899999976 : f32
    %172 = vector.broadcast %cst_72 : f32 to vector<16x8xf32>
    %173 = arith.mulf %172, %171 : vector<16x8xf32>
    %cst_73 = arith.constant 1.000000e-01 : f32
    %174 = vector.broadcast %cst_73 : f32 to vector<16x8xf32>
    %175 = arith.mulf %174, %132 : vector<16x8xf32>
    %176 = arith.addf %173, %175 : vector<16x8xf32>
    %177 = vector.extract_strided_slice %35 {offsets = [0, 24], sizes = [16, 8], strides = [1, 1]} : vector<16x32xf32> to vector<16x8xf32>
    %178 = vector.extract_strided_slice %29 {offsets = [0, 24], sizes = [16, 8], strides = [1, 1]} : vector<16x32xf32> to vector<16x8xf32>
    %179 = vector.extract_strided_slice %31 {offsets = [0, 24], sizes = [16, 8], strides = [1, 1]} : vector<16x32xf32> to vector<16x8xf32>
    %cst_74 = arith.constant dense<0.000000e+00> : vector<16x16xf32>
    %180 = tpu.matmul %177, %178, %cst_74 {dimension_numbers = #tpu.dot_dimension_numbers<[1], [1], [0], [0], [0, 0, 1, 0], [], []>} : vector<16x8xf32>, vector<16x8xf32>, vector<16x16xf32> -> vector<16x16xf32>
    %cst_75 = arith.constant dense<0xFF800000> : vector<16xf32>
    %181 = vector.multi_reduction <maximumf>, %180, %cst_75 [1] : vector<16x16xf32> to vector<16xf32>
    %182 = vector.shape_cast %181 : vector<16xf32> to vector<16x1xf32>
    %183 = vector.broadcast %182 : vector<16x1xf32> to vector<16x16xf32>
    %184 = arith.subf %180, %183 : vector<16x16xf32>
    %185 = math.exp %184 : vector<16x16xf32>
    %186 = arith.mulf %185, %1 : vector<16x16xf32>
    %cst_76 = arith.constant dense<0.000000e+00> : vector<16xf32>
    %187 = vector.multi_reduction <add>, %186, %cst_76 [1] : vector<16x16xf32> to vector<16xf32>
    %188 = vector.shape_cast %187 : vector<16xf32> to vector<16x1xf32>
    %cst_77 = arith.constant 1.000000e-30 : f32
    %189 = vector.broadcast %cst_77 : f32 to vector<16x1xf32>
    %190 = arith.maximumf %188, %189 : vector<16x1xf32>
    %191 = tpu.reciprocal %190 : vector<16x1xf32> -> vector<16x1xf32>
    %192 = vector.broadcast %191 : vector<16x1xf32> to vector<16x16xf32>
    %193 = arith.mulf %186, %192 : vector<16x16xf32>
    %cst_78 = arith.constant dense<0.000000e+00> : vector<16x8xf32>
    %194 = tpu.matmul %193, %179, %cst_78 {dimension_numbers = #tpu.dot_dimension_numbers<[1], [0], [0], [1], [0, 0, 1, 1], [], []>} : vector<16x16xf32>, vector<16x8xf32>, vector<16x8xf32> -> vector<16x8xf32>
    %cst_79 = arith.constant 0.899999976 : f32
    %195 = vector.broadcast %cst_79 : f32 to vector<16x8xf32>
    %196 = arith.mulf %195, %194 : vector<16x8xf32>
    %cst_80 = arith.constant 1.000000e-01 : f32
    %197 = vector.broadcast %cst_80 : f32 to vector<16x8xf32>
    %198 = arith.mulf %197, %179 : vector<16x8xf32>
    %199 = arith.addf %196, %198 : vector<16x8xf32>
    %cst_81 = arith.constant dense<0.000000e+00> : vector<16x8xf32>
    %200 = tpu.matmul %193, %199, %cst_81 {dimension_numbers = #tpu.dot_dimension_numbers<[1], [0], [0], [1], [0, 0, 1, 1], [], []>} : vector<16x16xf32>, vector<16x8xf32>, vector<16x8xf32> -> vector<16x8xf32>
    %cst_82 = arith.constant 0.899999976 : f32
    %201 = vector.broadcast %cst_82 : f32 to vector<16x8xf32>
    %202 = arith.mulf %201, %200 : vector<16x8xf32>
    %cst_83 = arith.constant 1.000000e-01 : f32
    %203 = vector.broadcast %cst_83 : f32 to vector<16x8xf32>
    %204 = arith.mulf %203, %179 : vector<16x8xf32>
    %205 = arith.addf %202, %204 : vector<16x8xf32>
    %cst_84 = arith.constant dense<0.000000e+00> : vector<16x8xf32>
    %206 = tpu.matmul %193, %205, %cst_84 {dimension_numbers = #tpu.dot_dimension_numbers<[1], [0], [0], [1], [0, 0, 1, 1], [], []>} : vector<16x16xf32>, vector<16x8xf32>, vector<16x8xf32> -> vector<16x8xf32>
    %cst_85 = arith.constant 0.899999976 : f32
    %207 = vector.broadcast %cst_85 : f32 to vector<16x8xf32>
    %208 = arith.mulf %207, %206 : vector<16x8xf32>
    %cst_86 = arith.constant 1.000000e-01 : f32
    %209 = vector.broadcast %cst_86 : f32 to vector<16x8xf32>
    %210 = arith.mulf %209, %179 : vector<16x8xf32>
    %211 = arith.addf %208, %210 : vector<16x8xf32>
    %cst_87 = arith.constant dense<0.000000e+00> : vector<16x8xf32>
    %212 = tpu.matmul %193, %211, %cst_87 {dimension_numbers = #tpu.dot_dimension_numbers<[1], [0], [0], [1], [0, 0, 1, 1], [], []>} : vector<16x16xf32>, vector<16x8xf32>, vector<16x8xf32> -> vector<16x8xf32>
    %cst_88 = arith.constant 0.899999976 : f32
    %213 = vector.broadcast %cst_88 : f32 to vector<16x8xf32>
    %214 = arith.mulf %213, %212 : vector<16x8xf32>
    %cst_89 = arith.constant 1.000000e-01 : f32
    %215 = vector.broadcast %cst_89 : f32 to vector<16x8xf32>
    %216 = arith.mulf %215, %179 : vector<16x8xf32>
    %217 = arith.addf %214, %216 : vector<16x8xf32>
    %cst_90 = arith.constant dense<0.000000e+00> : vector<16x8xf32>
    %218 = tpu.matmul %193, %217, %cst_90 {dimension_numbers = #tpu.dot_dimension_numbers<[1], [0], [0], [1], [0, 0, 1, 1], [], []>} : vector<16x16xf32>, vector<16x8xf32>, vector<16x8xf32> -> vector<16x8xf32>
    %cst_91 = arith.constant 0.899999976 : f32
    %219 = vector.broadcast %cst_91 : f32 to vector<16x8xf32>
    %220 = arith.mulf %219, %218 : vector<16x8xf32>
    %cst_92 = arith.constant 1.000000e-01 : f32
    %221 = vector.broadcast %cst_92 : f32 to vector<16x8xf32>
    %222 = arith.mulf %221, %179 : vector<16x8xf32>
    %223 = arith.addf %220, %222 : vector<16x8xf32>
    %224 = tpu.concatenate %82, %129, %176, %223 in 1 : vector<16x8xf32>, vector<16x8xf32>, vector<16x8xf32>, vector<16x8xf32> -> vector<16x32xf32>
    %225 = arith.addf %224, %0 : vector<16x32xf32>
    %cst_93 = arith.constant dense<0.000000e+00> : vector<16xf32>
    %226 = vector.multi_reduction <add>, %225, %cst_93 [1] : vector<16x32xf32> to vector<16xf32>
    %227 = vector.shape_cast %226 : vector<16xf32> to vector<16x1xf32>
    %cst_94 = arith.constant 3.200000e+01 : f32
    %228 = vector.broadcast %cst_94 : f32 to vector<16x1xf32>
    %229 = arith.divf %227, %228 : vector<16x1xf32>
    %230 = vector.broadcast %229 : vector<16x1xf32> to vector<16x32xf32>
    %231 = arith.subf %225, %230 : vector<16x32xf32>
    %232 = arith.mulf %231, %231 : vector<16x32xf32>
    %cst_95 = arith.constant dense<0.000000e+00> : vector<16xf32>
    %233 = vector.multi_reduction <add>, %232, %cst_95 [1] : vector<16x32xf32> to vector<16xf32>
    %234 = vector.shape_cast %233 : vector<16xf32> to vector<16x1xf32>
    %cst_96 = arith.constant 3.200000e+01 : f32
    %235 = vector.broadcast %cst_96 : f32 to vector<16x1xf32>
    %236 = arith.divf %234, %235 : vector<16x1xf32>
    %237 = vector.broadcast %229 : vector<16x1xf32> to vector<16x32xf32>
    %238 = arith.subf %225, %237 : vector<16x32xf32>
    %cst_97 = arith.constant 9.99999974E-6 : f32
    %239 = vector.broadcast %cst_97 : f32 to vector<16x1xf32>
    %240 = arith.addf %236, %239 : vector<16x1xf32>
    %241 = math.rsqrt %240 : vector<16x1xf32>
    %242 = vector.broadcast %241 : vector<16x1xf32> to vector<16x32xf32>
    %243 = arith.mulf %238, %242 : vector<16x32xf32>
    %c0_98 = arith.constant 0 : index
    %c0_99 = arith.constant 0 : index
    %244 = vector.load %arg7[%c0_98, %c0_99] : memref<1x32xf32, #tpu.memory_space<vmem>>, vector<1x32xf32>
    %245 = vector.broadcast %244 : vector<1x32xf32> to vector<16x32xf32>
    %246 = arith.mulf %243, %245 : vector<16x32xf32>
    %c0_100 = arith.constant 0 : index
    %c0_101 = arith.constant 0 : index
    %247 = vector.load %arg8[%c0_100, %c0_101] : memref<1x32xf32, #tpu.memory_space<vmem>>, vector<1x32xf32>
    %248 = vector.broadcast %247 : vector<1x32xf32> to vector<16x32xf32>
    %249 = arith.addf %246, %248 : vector<16x32xf32>
    %c0_102 = arith.constant 0 : index
    %c0_103 = arith.constant 0 : index
    %250 = vector.load %arg9[%c0_102, %c0_103] : memref<32x128xf32, #tpu.memory_space<vmem>>, vector<32x128xf32>
    %cst_104 = arith.constant dense<0.000000e+00> : vector<16x128xf32>
    %251 = tpu.matmul %249, %250, %cst_104 {dimension_numbers = #tpu.dot_dimension_numbers<[1], [0], [0], [1], [0, 0, 1, 1], [], []>} : vector<16x32xf32>, vector<32x128xf32>, vector<16x128xf32> -> vector<16x128xf32>
    %c0_105 = arith.constant 0 : index
    %c0_106 = arith.constant 0 : index
    %252 = vector.load %arg10[%c0_105, %c0_106] : memref<1x128xf32, #tpu.memory_space<vmem>>, vector<1x128xf32>
    %253 = vector.broadcast %252 : vector<1x128xf32> to vector<16x128xf32>
    %254 = arith.addf %251, %253 : vector<16x128xf32>
    %cst_107 = arith.constant 0.000000e+00 : f32
    %255 = vector.broadcast %cst_107 : f32 to vector<16x128xf32>
    %256 = arith.maximumf %254, %255 : vector<16x128xf32>
    %c0_108 = arith.constant 0 : index
    %c0_109 = arith.constant 0 : index
    %257 = vector.load %arg11[%c0_108, %c0_109] : memref<128x32xf32, #tpu.memory_space<vmem>>, vector<128x32xf32>
    %cst_110 = arith.constant dense<0.000000e+00> : vector<16x32xf32>
    %258 = tpu.matmul %256, %257, %cst_110 {dimension_numbers = #tpu.dot_dimension_numbers<[1], [0], [0], [1], [0, 0, 1, 1], [], []>} : vector<16x128xf32>, vector<128x32xf32>, vector<16x32xf32> -> vector<16x32xf32>
    %c0_111 = arith.constant 0 : index
    %c0_112 = arith.constant 0 : index
    %259 = vector.load %arg12[%c0_111, %c0_112] : memref<1x32xf32, #tpu.memory_space<vmem>>, vector<1x32xf32>
    %260 = vector.broadcast %259 : vector<1x32xf32> to vector<16x32xf32>
    %261 = arith.addf %258, %260 : vector<16x32xf32>
    %262 = arith.addf %261, %225 : vector<16x32xf32>
    %c0_113 = arith.constant 0 : index
    %c0_114 = arith.constant 0 : index
    %263 = vector.load %arg13[%c0_113, %c0_114] : memref<16x32xf32, #tpu.memory_space<vmem>>, vector<16x32xf32>
    tpu.vector_store %arg13[%c0_113, %c0_114], %262 {strides = array<i32>} : memref<16x32xf32, #tpu.memory_space<vmem>>, vector<16x32xf32>,
    return
  }
  func.func @transform_0(%arg0: i32) -> (i32, i32) {
    %c0_i32 = arith.constant 0 : i32
    %c0_i32_0 = arith.constant 0 : i32
    %c0_i32_1 = arith.constant 0 : i32
    return %c0_i32, %c0_i32_0 : i32, i32
  }
  func.func @transform_1(%arg0: i32) -> (i32, i32) {
    %c0_i32 = arith.constant 0 : i32
    %c0_i32_0 = arith.constant 0 : i32
    %c0_i32_1 = arith.constant 0 : i32
    return %c0_i32, %c0_i32_0 : i32, i32
  }
  func.func @transform_2(%arg0: i32) -> (i32, i32) {
    %c0_i32 = arith.constant 0 : i32
    %c0_i32_0 = arith.constant 0 : i32
    %c0_i32_1 = arith.constant 0 : i32
    return %c0_i32, %c0_i32_0 : i32, i32
  }
  func.func @transform_3(%arg0: i32) -> (i32, i32) {
    %c0_i32 = arith.constant 0 : i32
    %c0_i32_0 = arith.constant 0 : i32
    %c0_i32_1 = arith.constant 0 : i32
    return %c0_i32, %c0_i32_0 : i32, i32
  }
  func.func @transform_4(%arg0: i32) -> (i32, i32) {
    %c0_i32 = arith.constant 0 : i32
    %c0_i32_0 = arith.constant 0 : i32
    %c0_i32_1 = arith.constant 0 : i32
    return %c0_i32, %c0_i32_0 : i32, i32
  }
  func.func @transform_5(%arg0: i32) -> (i32, i32) {
    %c0_i32 = arith.constant 0 : i32
    %c0_i32_0 = arith.constant 0 : i32
    %c0_i32_1 = arith.constant 0 : i32
    return %c0_i32, %c0_i32_0 : i32, i32
  }
  func.func @transform_6(%arg0: i32) -> (i32, i32) {
    %c0_i32 = arith.constant 0 : i32
    %c0_i32_0 = arith.constant 0 : i32
    %c0_i32_1 = arith.constant 0 : i32
    return %c0_i32, %c0_i32_0 : i32, i32
  }
  func.func @transform_7(%arg0: i32) -> (i32, i32) {
    %c0_i32 = arith.constant 0 : i32
    %c0_i32_0 = arith.constant 0 : i32
    %c0_i32_1 = arith.constant 0 : i32
    return %c0_i32, %c0_i32_0 : i32, i32
  }
  func.func @transform_8(%arg0: i32) -> (i32, i32) {
    %c0_i32 = arith.constant 0 : i32
    %c0_i32_0 = arith.constant 0 : i32
    %c0_i32_1 = arith.constant 0 : i32
    return %c0_i32, %c0_i32_0 : i32, i32
  }
  func.func @transform_9(%arg0: i32) -> (i32, i32) {
    %c0_i32 = arith.constant 0 : i32
    %c0_i32_0 = arith.constant 0 : i32
    %c0_i32_1 = arith.constant 0 : i32
    return %c0_i32, %c0_i32_0 : i32, i32
  }
  func.func @transform_10(%arg0: i32) -> (i32, i32) {
    %c0_i32 = arith.constant 0 : i32
    %c0_i32_0 = arith.constant 0 : i32
    %c0_i32_1 = arith.constant 0 : i32
    return %c0_i32, %c0_i32_0 : i32, i32
  }
  func.func @transform_11(%arg0: i32) -> (i32, i32) {
    %c0_i32 = arith.constant 0 : i32
    %c0_i32_0 = arith.constant 0 : i32
    %c0_i32_1 = arith.constant 0 : i32
    return %c0_i32, %c0_i32_0 : i32, i32
  }
  func.func @transform_12(%arg0: i32) -> (i32, i32) {
    %c0_i32 = arith.constant 0 : i32
    %c0_i32_0 = arith.constant 0 : i32
    %c0_i32_1 = arith.constant 0 : i32
    return %c0_i32, %c0_i32_0 : i32, i32
  }
}

</mosaic_0001>

<bundles_post_ra>
// kernel: tpu_custom_call.1
= control target key start
LH: loop header
LB: loop body
LE: loop exit
PB: predicated region body
PF: predicated region fallthrough
CT: control target
= control target key end

     0   :  { %vm48_vm0 = vcmask 261120   ;;  %s3565_s0 = inlined_call_operand.vmem [shape: f32[16,32], index: 0, kind: input, shape index: {}]   ;;  %s3566_s1 = inlined_call_operand.vmem [shape: f32[16,16], index: 1, kind: input, shape index: {}]   ;;  %s3567_s2 = inlined_call_operand.vmem [shape: f32[16,1], index: 2, kind: input, shape index: {}]   ;;  %s3568_s3 = inlined_call_operand.vmem [shape: f32[1,32], index: 3, kind: input, shape index: {}]   ;;  %s3569_s4 = inlined_call_operand.vmem [shape: f32[1,32], index: 4, kind: input, shape index: {}]   ;;  %s3570_s5 = inlined_call_operand.vmem [shape: f32[32,96], index: 5, kind: input, shape index: {}]   ;;  %s3571_s6 = inlined_call_operand.vmem [shape: f32[1,32], index: 6, kind: input, shape index: {}]   ;;  %s3572_s7 = inlined_call_operand.vmem [shape: f32[1,32], index: 7, kind: input, shape index: {}]   ;;  %s3573_s8 = inlined_call_operand.vmem [shape: f32[32,128], index: 8, kind: input, shape index: {}]   ;;  %s3574_s9 = inlined_call_operand.vmem [shape: f32[1,128], index: 9, kind: input, shape index: {}]   ;;  %s3575_s10 = inlined_call_operand.vmem [shape: f32[128,32], index: 10, kind: input, shape index: {}]   ;;  %s3576_s11 = inlined_call_operand.vmem [shape: f32[1,32], index: 11, kind: input, shape index: {}]   ;;  %s3577_s12 = inlined_call_operand.hbm [shape: f32[16,32], index: 12, kind: output, shape index: {}]  }
   0x1   :  { %v42_v0 = vld [vmem:[%s3565_s0] sm:$0xff]  ;;  %v43_v1 = vld [vmem:[%s3565_s0 + $0x8] sm:$0xff] }
   0x2   :  { %17 = vsyncpa [#allocation3], 0  ;;  %v49_v2 = vsel %vm48_vm0, %v42_v0, 0.0  ;;  %v52_v3 = vsel %vm48_vm0, %v43_v1, 0.0  ;;  %v97_v14 = vld [vmem:[%s3570_s5 + $0x18] sm:$0xff]  ;;  %v96_v15 = vld [vmem:[%s3570_s5 + $0x10] sm:$0xff] }
   0x3   :  { %50 = vadd.xlane.f32.xlu0 %v49_v2  ;;  %2800 = vmatprep.subr.mxu0 %v97_v14  ;;  %v95_v16 = vld [vmem:[%s3570_s5 + $0x8] sm:$0xff]  ;;  %v94_v17 = vld [vmem:[%s3570_s5] sm:$0xff]  ;;  %v3108_v20 = vmov 0   ;;  %vm199_vm1 = vcmask 64512   ;;  %vm285_vm2 = vcmask 130048   ;;  %s3111_s21 = smov 120  }
   0x4   :  { %2801 = vmatpush3.msra.mxu0 %v97_v14  ;;  %v47_v18 = vld [vmem:[%s3567_s2 + $0x8] sm:$0xff]  ;;  %v46_v19 = vld [vmem:[%s3567_s2] sm:$0xff]  ;;  %3043 = vset.pattern.permute.xlu1 %v3108_v20  ;;  %s3112_s22 = smov 88   ;;  %s3114_s27 = smov 112   ;;  %vm2347_vm3 = vcmask 195584  }
   0x5   :  { %2802 = vmatprep.subr.mxu0 %v96_v15  ;;  %v180_v21 = vmul.f32 0.35355338, %v47_v18  ;;  %3042 = vset.pattern.permute.xlu0 %v3108_v20  ;;  %v179_v22 = vmul.f32 0.35355338, %v46_v19  ;;  %v2608_v30 = vld [vmem:[%s3568_s3] ss:$0 sm:$0xff] }
   0x6   :  { %2803 = vmatpush3.msra.mxu0 %v96_v15  ;;  %v2609_v32 = vld [vmem:[%s3569_s4] ss:$0 sm:$0xff]  ;;  %s3109_s3 = smov 96   ;;  %s3110_s4 = smov 64   ;;  %v3256_v57 = vld [vmem:[%s3566_s1 + $0x8] sm:$0xff] }
   0x7   :  { %53 = vadd.xlane.f32.xlu0 %v52_v3  ;;  %2804 = vmatprep.subr.mxu0 %v95_v16  ;;  %v3261_v59 = vld [vmem:[%s3566_s1] sm:$0xff]  ;;  %s3113_s1 = smov 56   ;;  %s3115_s28 = smov 80  }
   0x8   :  { %2805 = vmatpush3.msra.mxu0 %v95_v16  ;;  %s3116_s29 = smov 48   ;;  %s3117_s30 = smov 104  }
   0x9   :  { %2806 = vmatprep.subr.mxu0 %v94_v17  ;;  %s3118_s13 = smov 72   ;;  %s3119_s14 = smov 40  }
   0xa   :  { %2807 = vmatpush3.msra.mxu0 %v94_v17  ;;  %s3120_s15 = smov 8   ;;  %s3121_s16 = smov 16  }
   0xb   :  { %s3122_s17 = smov 24  }
  0x1d   :  { %183 = vperm.xlu0 %3042, %v179_v22  }
  0x8c   :  { %v51_v4 = vpop.xlane.xlu0 %50 }
  0x8d   :  { %v56_v5 = vmul.f32 0.03125, %v51_v4 }
  0x8f   :  { %v58_v6 = vsub.f32 %v42_v0, %v56_v5 }
  0x90   :  { %v54_v7 = vpop.xlane.xlu0 %53 }
  0x91   :  { %v57_v8 = vmul.f32 0.03125, %v54_v7  ;;  %v60_v9 = vmul.f32 %v58_v6, %v58_v6 }
  0x93   :  { %v59_v10 = vsub.f32 %v43_v1, %v57_v8  ;;  %v62_v11 = vsel %vm48_vm0, %v60_v9, 0.0 }
  0x94   :  { %63 = vadd.xlane.f32.xlu1 %v62_v11 }
  0x95   :  { %v61_v12 = vmul.f32 %v59_v10, %v59_v10 }
  0x97   :  { %v65_v13 = vsel %vm48_vm0, %v61_v12, 0.0 }
  0x98   :  { %66 = vadd.xlane.f32.xlu1 %v65_v13  ;;  %v184_v40 = vpop.permute.xlu0 %183 }
  0xa9   :  { %188 = vperm.xlu1 %3043, %v180_v21  }
 0x11d   :  { %v64_v23 = vpop.xlane.xlu1 %63 }
 0x11e   :  { %v68_v24 = vmul.f32 0.03125, %v64_v23 }
 0x120   :  { %v70_v25 = vadd.f32 1e-05, %v68_v24 }
 0x121   :  { %v67_v26 = vpop.xlane.xlu1 %66 }
 0x122   :  { %3044 = vrsqrt.f32 %v70_v25  ;;  %v69_v27 = vmul.f32 0.03125, %v67_v26 }
 0x124   :  { %v71_v28 = vadd.f32 1e-05, %v69_v27 }
 0x125   :  { %v189_v43 = vpop.permute.xlu1 %188 }
 0x126   :  { %3046 = vrsqrt.f32 %v71_v28 }
 0x12f   :  { %v3045_v29 = vpop.eup %3044 }
 0x130   :  { %v74_v31 = vmul.f32 %v3045_v29, %v58_v6 }
 0x132   :  { %v83_v33 = vmul.f32 %v2608_v30, %v74_v31 }
 0x133   :  { %v3047_v34 = vpop.eup %3046 }
 0x134   :  { %v75_v35 = vmul.f32 %v3047_v34, %v59_v10  ;;  %v92_v36 = vadd.f32 %v2609_v32, %v83_v33 }
 0x136   :  { %v84_v37 = vmul.f32 %v2608_v30, %v75_v35  ;;  %2808 = vmatprep.mubr.msk.f32.mxu0 %vm48_vm0, %v92_v36 }
 0x138   :  { %v93_v38 = vadd.f32 %v2609_v32, %v84_v37 }
 0x13a   :  { %2809 = vmatmul.mubr.msk.f32.vlgmr.msra.gmra.mxu0 %vm48_vm0, %v93_v38 }
 0x1fa   :  { %v3226_v39 = vpop.f32.mrf.mxu0 }
 0x1fb   :  { %2811 = vmatprep.subr.msk.mxu0 %vm199_vm1, %v3226_v39  ;;  %v3243_v44 = vmul.f32 %v3226_v39, %v189_v43  ;;  %v3269_v1 = vmul.f32 0.1, %v3226_v39 }
 0x1fc   :  { %v3230_v41 = vpop.f32.mrf.mxu0  ;;  %2812 = vmatpush3.xpose.msk.msra.mxu0 %vm199_vm1, %v3226_v39 }
 0x1fd   :  { %v3235_v42 = vmul.f32 %v184_v40, %v3230_v41  ;;  %2813 = vmatprep.subr.msk.mxu0 %vm199_vm1, %v3230_v41  ;;  %v3273_v2 = vmul.f32 0.1, %v3230_v41 }
 0x1ff   :  { %195 = vrot.lane.b32.xlu1 %v3235_v42, %s3109_s3 }
 0x200   :  { %2814 = vmatpush3.xpose.msk.msra.mxu0 %vm199_vm1, %v3230_v41 }
 0x203   :  { %197 = vrot.lane.b32.xlu1 %v3243_v44, %s3109_s3 }
 0x271   :  { %v196_v45 = vpop.permute.xlu1 %195 }
 0x272   :  { %2815 = vmatprep.mubr.msk.f32.mxu0 %vm199_vm1, %v196_v45 }
 0x275   :  { %v198_v46 = vpop.permute.xlu1 %197 }
 0x276   :  { %2816 = vmatmul.mubr.msk.f32.vlgmr.msra.gmra.mxu0 %vm199_vm1, %v198_v46 }
 0x336   :  { %v2817_v47 = vpop.f32.mrf.mxu0 }
 0x337   :  { %v289_v48 = vsel %vm285_vm2, %v2817_v47, -inf }
 0x338   :  { %290 = vmax.xlane.f32.xlu0 %v289_v48  ;;  %v276_v49 = vpop.f32.mrf.mxu0 }
 0x339   :  { %v286_v50 = vsel %vm285_vm2, %v276_v49, -inf }
 0x33a   :  { %287 = vmax.xlane.f32.xlu1 %v286_v50 }
 0x34e   :  { %312 = vrot.lane.b32.xlu0 %v3230_v41, %s3110_s4 }
 0x352   :  { %733 = vrot.lane.b32.xlu0 %v3230_v41, %s3111_s21 }
 0x356   :  { %731 = vrot.lane.b32.xlu0 %v3243_v44, %s3112_s22 }
 0x3c1   :  { %v291_v51 = vpop.xlane.xlu0 %290 }
 0x3c2   :  { %v293_v52 = vsub.f32 %v2817_v47, %v291_v51 }
 0x3c3   :  { %v288_v53 = vpop.xlane.xlu1 %287 }
 0x3c4   :  { %v296_v54 = vmul.f32 1.442695, %v293_v52  ;;  %v292_v55 = vsub.f32 %v276_v49, %v288_v53 }
 0x3c5   :  { %v313_v8 = vpop.permute.xlu0 %312 }
 0x3c6   :  { %3048 = vpow2.f32 %v296_v54  ;;  %v294_v56 = vmul.f32 1.442695, %v292_v55 }
 0x3c8   :  { %3050 = vpow2.f32 %v294_v56 }
 0x3c9   :  { %v734_v35 = vpop.permute.xlu0 %733 }
 0x3cd   :  { %v732_v36 = vpop.permute.xlu0 %731 }
 0x3d3   :  { %v3049_v58 = vpop.eup %3048 }
 0x3d4   :  { %v299_v60 = vmul.f32 %v3049_v58, %v3256_v57 }
 0x3d5   :  { %v3051_v61 = vpop.eup %3050 }
 0x3d6   :  { %v303_v62 = vsel %vm285_vm2, %v299_v60, 0.0  ;;  %v298_v63 = vmul.f32 %v3051_v61, %v3261_v59 }
 0x3d7   :  { %304 = vadd.xlane.f32.xlu1 %v303_v62 }
 0x3d8   :  { %v300_v0 = vsel %vm285_vm2, %v298_v63, 0.0 }
 0x3db   :  { %301 = vadd.xlane.f32.xlu1 %v300_v0 }
 0x3ec   :  { %314 = vrot.lane.b32.xlu1 %v3226_v39, %s3110_s4 }
 0x3f0   :  { %407 = vrot.lane.b32.xlu1 %v3269_v1, %s3110_s4 }
 0x3f4   :  { %405 = vrot.lane.b32.xlu1 %v3273_v2, %s3110_s4 }
 0x3f8   :  { %735 = vrot.lane.b32.xlu1 %v3226_v39, %s3111_s21 }
 0x3fc   :  { %729 = vrot.lane.b32.xlu1 %v3235_v42, %s3112_s22 }
 0x460   :  { %v305_v3 = vpop.xlane.xlu1 %304 }
 0x461   :  { %v307_v4 = vmax.f32 %v305_v3, 1e-30 }
 0x463   :  { %3052 = vrcp.f32 %v307_v4 }
 0x464   :  { %v302_v5 = vpop.xlane.xlu1 %301 }
 0x465   :  { %v306_v6 = vmax.f32 %v302_v5, 1e-30 }
 0x467   :  { %3054 = vrcp.f32 %v306_v6 }
 0x468   :  { %v315_v7 = vpop.permute.xlu1 %314 }
 0x469   :  { %2818 = vmatprep.subr.mxu0 %v315_v7 }
 0x46a   :  { %2819 = vmatpush3.msra.mxu0 %v315_v7 }
 0x46b   :  { %2820 = vmatprep.subr.mxu0 %v313_v8 }
 0x46c   :  { %2821 = vmatpush3.msra.mxu0 %v313_v8  ;;  %v3285_v13 = vpop.permute.xlu1 %407 }
 0x470   :  { %v3053_v9 = vpop.eup %3052  ;;  %v3288_v19 = vpop.permute.xlu1 %405 }
 0x471   :  { %v3278_v12 = vmul.f32 %v3053_v9, %v299_v60 }
 0x474   :  { %v3055_v10 = vpop.eup %3054  ;;  %v736_v30 = vpop.permute.xlu1 %735 }
 0x475   :  { %v310_v11 = vmul.f32 %v3055_v10, %v298_v63 }
 0x477   :  { %2822 = vmatprep.mubr.msk.f32.mxu0 %vm285_vm2, %v310_v11  ;;  %2843 = vmatprep.mubr.msk.f32.mxu1 %vm285_vm2, %v310_v11 }
 0x478   :  { %2823 = vmatmul.mubr.msk.f32.vlgmr.msra.gmra.mxu0 %vm285_vm2, %v3278_v12  ;;  %v730_v34 = vpop.permute.xlu1 %729 }
 0x479   :  { %2829 = vmatprep.mubr.msk.f32.mxu0 %vm285_vm2, %v310_v11 }
 0x538   :  { %v2824_v14 = vpop.f32.mrf.mxu0 }
 0x539   :  { %v400_v15 = vmul.f32 0.9, %v2824_v14 }
 0x53a   :  { %v390_v16 = vpop.f32.mrf.mxu0 }
 0x53b   :  { %v412_v17 = vadd.f32 %v3285_v13, %v400_v15  ;;  %v399_v18 = vmul.f32 0.9, %v390_v16 }
 0x53d   :  { %v411_v20 = vadd.f32 %v3288_v19, %v399_v18  ;;  %2825 = vmatprep.subr.mxu0 %v412_v17 }
 0x53e   :  { %2826 = vmatpush3.msra.mxu0 %v412_v17 }
 0x53f   :  { %2827 = vmatprep.subr.mxu0 %v411_v20 }
 0x540   :  { %2828 = vmatpush3.msra.mxu0 %v411_v20 }
 0x541   :  { %2830 = vmatmul.mubr.msk.f32.vlgmr.msra.gmra.mxu0 %vm285_vm2, %v3278_v12 }
 0x542   :  { %2836 = vmatprep.mubr.msk.f32.mxu0 %vm285_vm2, %v310_v11 }
 0x601   :  { %v2831_v21 = vpop.f32.mrf.mxu0 }
 0x602   :  { %v489_v22 = vmul.f32 0.9, %v2831_v21 }
 0x603   :  { %v479_v23 = vpop.f32.mrf.mxu0 }
 0x604   :  { %v491_v24 = vadd.f32 %v489_v22, %v3285_v13  ;;  %v488_v25 = vmul.f32 0.9, %v479_v23 }
 0x606   :  { %v490_v26 = vadd.f32 %v488_v25, %v3288_v19  ;;  %2832 = vmatprep.subr.mxu0 %v491_v24 }
 0x607   :  { %2833 = vmatpush3.msra.mxu0 %v491_v24 }
 0x608   :  { %2834 = vmatprep.subr.mxu0 %v490_v26 }
 0x609   :  { %2835 = vmatpush3.msra.mxu0 %v490_v26 }
 0x60a   :  { %2837 = vmatmul.mubr.msk.f32.vlgmr.msra.gmra.mxu0 %vm285_vm2, %v3278_v12 }
 0x60b   :  { %2850 = vmatprep.mubr.msk.f32.mxu0 %vm285_vm2, %v310_v11 }
 0x6ca   :  { %v2838_v27 = vpop.f32.mrf.mxu0 }
 0x6cb   :  { %v568_v28 = vmul.f32 0.9, %v2838_v27 }
 0x6cc   :  { %v558_v29 = vpop.f32.mrf.mxu0 }
 0x6cd   :  { %v567_v31 = vmul.f32 0.9, %v558_v29  ;;  %v570_v32 = vadd.f32 %v568_v28, %v3285_v13 }
 0x6cf   :  { %v569_v33 = vadd.f32 %v567_v31, %v3288_v19  ;;  %2839 = vmatprep.subr.mxu1 %v570_v32 }
 0x6d0   :  { %2840 = vmatpush3.msra.mxu1 %v570_v32 }
 0x6d1   :  { %2841 = vmatprep.subr.mxu1 %v569_v33 }
 0x6d2   :  { %2842 = vmatpush3.msra.mxu1 %v569_v33 }
 0x6d3   :  { %2844 = vmatmul.mubr.msk.f32.vlgmr.msra.gmra.mxu1 %vm285_vm2, %v3278_v12  ;;  %2853 = vmatprep.subr.msk.mxu1 %vm199_vm1, %v736_v30 }
 0x6d4   :  { %2854 = vmatpush3.xpose.msk.msra.mxu1 %vm199_vm1, %v736_v30  ;;  %2857 = vmatprep.mubr.msk.f32.mxu1 %vm199_vm1, %v730_v34 }
 0x6d5   :  { %2855 = vmatprep.subr.msk.mxu1 %vm199_vm1, %v734_v35 }
 0x6d8   :  { %2856 = vmatpush3.xpose.msk.msra.mxu1 %vm199_vm1, %v734_v35 }
 0x6db   :  { %2858 = vmatmul.mubr.msk.f32.vlgmr.msra.gmra.mxu1 %vm199_vm1, %v732_v36 }
 0x793   :  { %v2845_v37 = vpop.f32.mrf.mxu1 }
 0x794   :  { %v647_v38 = vmul.f32 0.9, %v2845_v37 }
 0x795   :  { %v637_v40 = vpop.f32.mrf.mxu1 }
 0x796   :  { %v649_v43 = vadd.f32 %v647_v38, %v3285_v13  ;;  %v646_v45 = vmul.f32 0.9, %v637_v40 }
 0x798   :  { %v648_v46 = vadd.f32 %v646_v45, %v3288_v19  ;;  %2846 = vmatprep.subr.mxu0 %v649_v43 }
 0x799   :  { %2847 = vmatpush3.msra.mxu0 %v649_v43 }
 0x79a   :  { %2848 = vmatprep.subr.mxu0 %v648_v46 }
 0x79b   :  { %2849 = vmatpush3.msra.mxu0 %v648_v46  ;;  %v2859_v47 = vpop.f32.mrf.mxu1 }
 0x79c   :  { %2851 = vmatmul.mubr.msk.f32.vlgmr.msra.gmra.mxu0 %vm285_vm2, %v3278_v12  ;;  %v823_v48 = vsel %vm285_vm2, %v2859_v47, -inf }
 0x79d   :  { %824 = vmax.xlane.f32.xlu0 %v823_v48  ;;  %v811_v49 = vpop.f32.mrf.mxu1 }
 0x79e   :  { %v820_v50 = vsel %vm285_vm2, %v811_v49, -inf }
 0x79f   :  { %821 = vmax.xlane.f32.xlu1 %v820_v50 }
 0x826   :  { %v825_v51 = vpop.xlane.xlu0 %824 }
 0x827   :  { %v827_v52 = vsub.f32 %v2859_v47, %v825_v51 }
 0x828   :  { %v822_v53 = vpop.xlane.xlu1 %821 }
 0x829   :  { %v830_v54 = vmul.f32 1.442695, %v827_v52  ;;  %v826_v55 = vsub.f32 %v811_v49, %v822_v53 }
 0x82b   :  { %3056 = vpow2.f32 %v830_v54  ;;  %v828_v56 = vmul.f32 1.442695, %v826_v55 }
 0x82d   :  { %3058 = vpow2.f32 %v828_v56 }
 0x838   :  { %v3057_v58 = vpop.eup %3056 }
 0x839   :  { %v833_v60 = vmul.f32 %v3057_v58, %v3256_v57 }
 0x83a   :  { %v3059_v61 = vpop.eup %3058 }
 0x83b   :  { %v837_v62 = vsel %vm285_vm2, %v833_v60, 0.0  ;;  %v832_v63 = vmul.f32 %v3059_v61, %v3261_v59 }
 0x83c   :  { %838 = vadd.xlane.f32.xlu1 %v837_v62 }
 0x83d   :  { %v834_v0 = vsel %vm285_vm2, %v832_v63, 0.0 }
 0x83e   :  { %835 = vadd.xlane.f32.xlu0 %v834_v0 }
 0x84d   :  { %846 = vrot.lane.b32.xlu1 %v3230_v41, %s3113_s1 }
 0x851   :  { %937 = vrot.lane.b32.xlu1 %v3269_v1, %s3113_s1 }
 0x854   :  { %848 = vrot.lane.b32.xlu0 %v3226_v39, %s3113_s1 }
 0x855   :  { %1265 = vrot.lane.b32.xlu1 %v3226_v39, %s3114_s27 }
 0x858   :  { %935 = vrot.lane.b32.xlu0 %v3273_v2, %s3113_s1 }
 0x859   :  { %1259 = vrot.lane.b32.xlu1 %v3235_v42, %s3115_s28 }
 0x85c   :  { %1263 = vrot.lane.b32.xlu0 %v3230_v41, %s3114_s27  ;;  %v3334_v14 = vpop.f32.mrf.mxu0 }
 0x85e   :  { %v3336_v15 = vpop.f32.mrf.mxu0 }
 0x860   :  { %1261 = vrot.lane.b32.xlu0 %v3243_v44, %s3115_s28 }
 0x8c5   :  { %v839_v3 = vpop.xlane.xlu1 %838 }
 0x8c6   :  { %v841_v4 = vmax.f32 %v839_v3, 1e-30 }
 0x8c7   :  { %v836_v5 = vpop.xlane.xlu0 %835 }
 0x8c8   :  { %v840_v6 = vmax.f32 %v836_v5, 1e-30  ;;  %3060 = vrcp.f32 %v841_v4 }
 0x8c9   :  { %v847_v8 = vpop.permute.xlu1 %846 }
 0x8ca   :  { %3062 = vrcp.f32 %v840_v6 }
 0x8cb   :  { %v849_v7 = vpop.permute.xlu0 %848 }
 0x8cc   :  { %2860 = vmatprep.subr.mxu0 %v849_v7 }
 0x8cd   :  { %2861 = vmatpush3.msra.mxu0 %v849_v7  ;;  %v3338_v18 = vpop.permute.xlu1 %937 }
 0x8ce   :  { %2862 = vmatprep.subr.mxu0 %v847_v8 }
 0x8cf   :  { %2863 = vmatpush3.msra.mxu0 %v847_v8  ;;  %v3341_v23 = vpop.permute.xlu0 %935 }
 0x8d1   :  { %v1266_v34 = vpop.permute.xlu1 %1265 }
 0x8d3   :  { %v1264_v40 = vpop.permute.xlu0 %1263 }
 0x8d5   :  { %v3061_v9 = vpop.eup %3060  ;;  %v1260_v38 = vpop.permute.xlu1 %1259 }
 0x8d6   :  { %v3327_v12 = vmul.f32 %v3061_v9, %v833_v60 }
 0x8d7   :  { %v3063_v10 = vpop.eup %3062  ;;  %v1262_v43 = vpop.permute.xlu0 %1261 }
 0x8d8   :  { %v844_v11 = vmul.f32 %v3063_v10, %v832_v63 }
 0x8da   :  { %2864 = vmatprep.mubr.msk.f32.mxu0 %vm285_vm2, %v844_v11  ;;  %2878 = vmatprep.mubr.msk.f32.mxu1 %vm285_vm2, %v844_v11 }
 0x8db   :  { %2865 = vmatmul.mubr.msk.f32.vlgmr.msra.gmra.mxu0 %vm285_vm2, %v3327_v12 }
 0x8dc   :  { %2871 = vmatprep.mubr.msk.f32.mxu0 %vm285_vm2, %v844_v11 }
 0x99b   :  { %v2866_v16 = vpop.f32.mrf.mxu0 }
 0x99c   :  { %v934_v17 = vmul.f32 0.9, %v2866_v16 }
 0x99d   :  { %v924_v20 = vpop.f32.mrf.mxu0 }
 0x99e   :  { %v942_v21 = vadd.f32 %v3338_v18, %v934_v17  ;;  %v933_v22 = vmul.f32 0.9, %v924_v20 }
 0x9a0   :  { %v941_v24 = vadd.f32 %v3341_v23, %v933_v22  ;;  %2867 = vmatprep.subr.mxu0 %v942_v21 }
 0x9a1   :  { %2868 = vmatpush3.msra.mxu0 %v942_v21 }
 0x9a2   :  { %2869 = vmatprep.subr.mxu0 %v941_v24 }
 0x9a3   :  { %2870 = vmatpush3.msra.mxu0 %v941_v24 }
 0x9a4   :  { %2872 = vmatmul.mubr.msk.f32.vlgmr.msra.gmra.mxu0 %vm285_vm2, %v3327_v12 }
 0x9a5   :  { %2885 = vmatprep.mubr.msk.f32.mxu0 %vm285_vm2, %v844_v11 }
 0xa64   :  { %v2873_v25 = vpop.f32.mrf.mxu0 }
 0xa65   :  { %v1019_v26 = vmul.f32 0.9, %v2873_v25 }
 0xa66   :  { %v1009_v27 = vpop.f32.mrf.mxu0 }
 0xa67   :  { %v1021_v28 = vadd.f32 %v1019_v26, %v3338_v18  ;;  %v1018_v29 = vmul.f32 0.9, %v1009_v27 }
 0xa69   :  { %v1020_v30 = vadd.f32 %v1018_v29, %v3341_v23  ;;  %2874 = vmatprep.subr.mxu1 %v1021_v28 }
 0xa6a   :  { %2875 = vmatpush3.msra.mxu1 %v1021_v28 }
 0xa6b   :  { %2876 = vmatprep.subr.mxu1 %v1020_v30 }
 0xa6c   :  { %2877 = vmatpush3.msra.mxu1 %v1020_v30 }
 0xa6d   :  { %2879 = vmatmul.mubr.msk.f32.vlgmr.msra.gmra.mxu1 %vm285_vm2, %v3327_v12 }
 0xa6e   :  { %2892 = vmatprep.mubr.msk.f32.mxu1 %vm285_vm2, %v844_v11 }
 0xb2d   :  { %v2880_v31 = vpop.f32.mrf.mxu1 }
 0xb2e   :  { %v1098_v32 = vmul.f32 0.9, %v2880_v31 }
 0xb2f   :  { %v1088_v33 = vpop.f32.mrf.mxu1 }
 0xb30   :  { %v1100_v35 = vadd.f32 %v1098_v32, %v3338_v18  ;;  %v1097_v36 = vmul.f32 0.9, %v1088_v33 }
 0xb32   :  { %v1099_v37 = vadd.f32 %v1097_v36, %v3341_v23  ;;  %2881 = vmatprep.subr.mxu0 %v1100_v35 }
 0xb33   :  { %2882 = vmatpush3.msra.mxu0 %v1100_v35 }
 0xb34   :  { %2883 = vmatprep.subr.mxu0 %v1099_v37 }
 0xb35   :  { %2884 = vmatpush3.msra.mxu0 %v1099_v37 }
 0xb36   :  { %2886 = vmatmul.mubr.msk.f32.vlgmr.msra.gmra.mxu0 %vm285_vm2, %v3327_v12  ;;  %2895 = vmatprep.subr.msk.mxu0 %vm199_vm1, %v1266_v34 }
 0xb37   :  { %2896 = vmatpush3.xpose.msk.msra.mxu0 %vm199_vm1, %v1266_v34  ;;  %2899 = vmatprep.mubr.msk.f32.mxu0 %vm199_vm1, %v1260_v38 }
 0xb38   :  { %2897 = vmatprep.subr.msk.mxu0 %vm199_vm1, %v1264_v40 }
 0xb3b   :  { %2898 = vmatpush3.xpose.msk.msra.mxu0 %vm199_vm1, %v1264_v40 }
 0xb3e   :  { %2900 = vmatmul.mubr.msk.f32.vlgmr.msra.gmra.mxu0 %vm199_vm1, %v1262_v43 }
 0xbf6   :  { %v2887_v45 = vpop.f32.mrf.mxu0 }
 0xbf7   :  { %v1177_v46 = vmul.f32 0.9, %v2887_v45 }
 0xbf8   :  { %v1167_v47 = vpop.f32.mrf.mxu0 }
 0xbf9   :  { %v1179_v48 = vadd.f32 %v1177_v46, %v3338_v18  ;;  %v1176_v49 = vmul.f32 0.9, %v1167_v47 }
 0xbfb   :  { %v1178_v50 = vadd.f32 %v1176_v49, %v3341_v23  ;;  %2888 = vmatprep.subr.mxu1 %v1179_v48 }
 0xbfc   :  { %2889 = vmatpush3.msra.mxu1 %v1179_v48 }
 0xbfd   :  { %2890 = vmatprep.subr.mxu1 %v1178_v50 }
 0xbfe   :  { %2891 = vmatpush3.msra.mxu1 %v1178_v50  ;;  %v2901_v51 = vpop.f32.mrf.mxu0 }
 0xbff   :  { %2893 = vmatmul.mubr.msk.f32.vlgmr.msra.gmra.mxu1 %vm285_vm2, %v3327_v12  ;;  %v1353_v52 = vsel %vm285_vm2, %v2901_v51, -inf }
 0xc00   :  { %1354 = vmax.xlane.f32.xlu0 %v1353_v52  ;;  %v1341_v53 = vpop.f32.mrf.mxu0 }
 0xc01   :  { %v1350_v54 = vsel %vm285_vm2, %v1341_v53, -inf }
 0xc02   :  { %1351 = vmax.xlane.f32.xlu1 %v1350_v54 }
 0xc89   :  { %v1355_v55 = vpop.xlane.xlu0 %1354 }
 0xc8a   :  { %v1357_v56 = vsub.f32 %v2901_v51, %v1355_v55 }
 0xc8b   :  { %v1352_v58 = vpop.xlane.xlu1 %1351 }
 0xc8c   :  { %v1360_v60 = vmul.f32 1.442695, %v1357_v56  ;;  %v1356_v61 = vsub.f32 %v1341_v53, %v1352_v58 }
 0xc8e   :  { %3064 = vpow2.f32 %v1360_v60  ;;  %v1358_v62 = vmul.f32 1.442695, %v1356_v61 }
 0xc90   :  { %3066 = vpow2.f32 %v1358_v62 }
 0xc9b   :  { %v3065_v63 = vpop.eup %3064 }
 0xc9c   :  { %v1363_v0 = vmul.f32 %v3065_v63, %v3256_v57 }
 0xc9d   :  { %v3067_v3 = vpop.eup %3066 }
 0xc9e   :  { %v1367_v4 = vsel %vm285_vm2, %v1363_v0, 0.0  ;;  %v1362_v5 = vmul.f32 %v3067_v3, %v3261_v59 }
 0xc9f   :  { %1368 = vadd.xlane.f32.xlu1 %v1367_v4 }
 0xca0   :  { %v1364_v6 = vsel %vm285_vm2, %v1362_v5, 0.0 }
 0xca1   :  { %1365 = vadd.xlane.f32.xlu0 %v1364_v6 }
 0xcb0   :  { %1376 = vrot.lane.b32.xlu1 %v3230_v41, %s3116_s29 }
 0xcb4   :  { %1467 = vrot.lane.b32.xlu1 %v3269_v1, %s3116_s29 }
 0xcb7   :  { %1378 = vrot.lane.b32.xlu0 %v3226_v39, %s3116_s29 }
 0xcb8   :  { %1795 = vrot.lane.b32.xlu1 %v3226_v39, %s3117_s30 }
 0xcbb   :  { %1465 = vrot.lane.b32.xlu0 %v3273_v2, %s3116_s29 }
 0xcbc   :  { %1789 = vrot.lane.b32.xlu1 %v3235_v42, %s3118_s13 }
 0xcbf   :  { %1793 = vrot.lane.b32.xlu0 %v3230_v41, %s3117_s30 }
 0xcc3   :  { %1791 = vrot.lane.b32.xlu0 %v3243_v44, %s3118_s13  ;;  %v3387_v44 = vpop.f32.mrf.mxu1 }
 0xcc5   :  { %v3389_v21 = vpop.f32.mrf.mxu1 }
 0xd28   :  { %v1369_v7 = vpop.xlane.xlu1 %1368 }
 0xd29   :  { %v1371_v8 = vmax.f32 %v1369_v7, 1e-30 }
 0xd2a   :  { %v1366_v9 = vpop.xlane.xlu0 %1365 }
 0xd2b   :  { %v1370_v10 = vmax.f32 %v1366_v9, 1e-30  ;;  %3068 = vrcp.f32 %v1371_v8 }
 0xd2c   :  { %v1377_v12 = vpop.permute.xlu1 %1376 }
 0xd2d   :  { %3070 = vrcp.f32 %v1370_v10 }
 0xd2e   :  { %v1379_v11 = vpop.permute.xlu0 %1378 }
 0xd2f   :  { %2902 = vmatprep.subr.mxu1 %v1379_v11 }
 0xd30   :  { %2903 = vmatpush3.msra.mxu1 %v1379_v11  ;;  %v3391_v25 = vpop.permute.xlu1 %1467 }
 0xd31   :  { %2904 = vmatprep.subr.mxu1 %v1377_v12 }
 0xd32   :  { %2905 = vmatpush3.msra.mxu1 %v1377_v12  ;;  %v3394_v29 = vpop.permute.xlu0 %1465 }
 0xd34   :  { %v1796_v43 = vpop.permute.xlu1 %1795 }
 0xd36   :  { %v1794_v49 = vpop.permute.xlu0 %1793 }
 0xd38   :  { %v3069_v16 = vpop.eup %3068  ;;  %v1790_v48 = vpop.permute.xlu1 %1789 }
 0xd39   :  { %v3380_v42 = vmul.f32 %v3069_v16, %v1363_v0  ;;  %v1255_v16 = vmul.f32 0.9, %v3389_v21 }
 0xd3a   :  { %v3071_v17 = vpop.eup %3070  ;;  %v1792_v50 = vpop.permute.xlu0 %1791 }
 0xd3b   :  { %v1374_v20 = vmul.f32 %v3071_v17, %v1362_v5  ;;  %v1257_v17 = vadd.f32 %v1255_v16, %v3341_v23 }
 0xd3d   :  { %2906 = vmatprep.mubr.msk.f32.mxu1 %vm285_vm2, %v1374_v20  ;;  %2920 = vmatprep.mubr.msk.f32.mxu0 %vm285_vm2, %v1374_v20 }
 0xd3e   :  { %2907 = vmatmul.mubr.msk.f32.vlgmr.msra.gmra.mxu1 %vm285_vm2, %v3380_v42 }
 0xd3f   :  { %2913 = vmatprep.mubr.msk.f32.mxu1 %vm285_vm2, %v1374_v20 }
 0xdfe   :  { %v2908_v22 = vpop.f32.mrf.mxu1 }
 0xdff   :  { %v1464_v24 = vmul.f32 0.9, %v2908_v22 }
 0xe00   :  { %v1454_v26 = vpop.f32.mrf.mxu1 }
 0xe01   :  { %v1472_v27 = vadd.f32 %v3391_v25, %v1464_v24  ;;  %v1463_v28 = vmul.f32 0.9, %v1454_v26 }
 0xe03   :  { %v1471_v30 = vadd.f32 %v3394_v29, %v1463_v28  ;;  %2909 = vmatprep.subr.mxu1 %v1472_v27 }
 0xe04   :  { %2910 = vmatpush3.msra.mxu1 %v1472_v27 }
 0xe05   :  { %2911 = vmatprep.subr.mxu1 %v1471_v30 }
 0xe06   :  { %2912 = vmatpush3.msra.mxu1 %v1471_v30 }
 0xe07   :  { %2914 = vmatmul.mubr.msk.f32.vlgmr.msra.gmra.mxu1 %vm285_vm2, %v3380_v42 }
 0xe08   :  { %2927 = vmatprep.mubr.msk.f32.mxu1 %vm285_vm2, %v1374_v20 }
 0xec7   :  { %v2915_v31 = vpop.f32.mrf.mxu1 }
 0xec8   :  { %v1549_v32 = vmul.f32 0.9, %v2915_v31 }
 0xec9   :  { %v1539_v33 = vpop.f32.mrf.mxu1 }
 0xeca   :  { %v1551_v34 = vadd.f32 %v1549_v32, %v3391_v25  ;;  %v1548_v35 = vmul.f32 0.9, %v1539_v33 }
 0xecc   :  { %v1550_v36 = vadd.f32 %v1548_v35, %v3394_v29  ;;  %2916 = vmatprep.subr.mxu0 %v1551_v34 }
 0xecd   :  { %2917 = vmatpush3.msra.mxu0 %v1551_v34 }
 0xece   :  { %2918 = vmatprep.subr.mxu0 %v1550_v36 }
 0xecf   :  { %2919 = vmatpush3.msra.mxu0 %v1550_v36 }
 0xed0   :  { %2921 = vmatmul.mubr.msk.f32.vlgmr.msra.gmra.mxu0 %vm285_vm2, %v3380_v42 }
 0xed1   :  { %2934 = vmatprep.mubr.msk.f32.mxu0 %vm285_vm2, %v1374_v20 }
 0xf90   :  { %v2922_v37 = vpop.f32.mrf.mxu0 }
 0xf91   :  { %v1628_v38 = vmul.f32 0.9, %v2922_v37 }
 0xf92   :  { %v1618_v40 = vpop.f32.mrf.mxu0 }
 0xf93   :  { %v1630_v45 = vadd.f32 %v1628_v38, %v3391_v25  ;;  %v1627_v46 = vmul.f32 0.9, %v1618_v40 }
 0xf95   :  { %v1629_v47 = vadd.f32 %v1627_v46, %v3394_v29  ;;  %2923 = vmatprep.subr.mxu1 %v1630_v45 }
 0xf96   :  { %2924 = vmatpush3.msra.mxu1 %v1630_v45 }
 0xf97   :  { %2925 = vmatprep.subr.mxu1 %v1629_v47 }
 0xf98   :  { %2926 = vmatpush3.msra.mxu1 %v1629_v47 }
 0xf99   :  { %2928 = vmatmul.mubr.msk.f32.vlgmr.msra.gmra.mxu1 %vm285_vm2, %v3380_v42  ;;  %2937 = vmatprep.subr.msk.mxu1 %vm199_vm1, %v1796_v43 }
 0xf9a   :  { %2938 = vmatpush3.xpose.msk.msra.mxu1 %vm199_vm1, %v1796_v43  ;;  %2941 = vmatprep.mubr.msk.f32.mxu1 %vm199_vm1, %v1790_v48 }
 0xf9b   :  { %2939 = vmatprep.subr.msk.mxu1 %vm199_vm1, %v1794_v49 }
 0xf9e   :  { %2940 = vmatpush3.xpose.msk.msra.mxu1 %vm199_vm1, %v1794_v49 }
 0xfa1   :  { %2942 = vmatmul.mubr.msk.f32.vlgmr.msra.gmra.mxu1 %vm199_vm1, %v1792_v50 }
0x1059   :  { %v2929_v51 = vpop.f32.mrf.mxu1 }
0x105a   :  { %v1707_v52 = vmul.f32 0.9, %v2929_v51 }
0x105b   :  { %v1697_v53 = vpop.f32.mrf.mxu1 }
0x105c   :  { %v1709_v54 = vadd.f32 %v1707_v52, %v3391_v25  ;;  %v1706_v55 = vmul.f32 0.9, %v1697_v53 }
0x105e   :  { %v1708_v56 = vadd.f32 %v1706_v55, %v3394_v29  ;;  %2930 = vmatprep.subr.mxu0 %v1709_v54 }
0x105f   :  { %2931 = vmatpush3.msra.mxu0 %v1709_v54 }
0x1060   :  { %2932 = vmatprep.subr.mxu0 %v1708_v56 }
0x1061   :  { %2933 = vmatpush3.msra.mxu0 %v1708_v56  ;;  %v2943_v58 = vpop.f32.mrf.mxu1 }
0x1062   :  { %2935 = vmatmul.mubr.msk.f32.vlgmr.msra.gmra.mxu0 %vm285_vm2, %v3380_v42  ;;  %v1883_v60 = vsel %vm285_vm2, %v2943_v58, -inf }
0x1063   :  { %1884 = vmax.xlane.f32.xlu0 %v1883_v60  ;;  %v1871_v61 = vpop.f32.mrf.mxu1 }
0x1064   :  { %v1880_v62 = vsel %vm285_vm2, %v1871_v61, -inf }
0x1065   :  { %1881 = vmax.xlane.f32.xlu1 %v1880_v62 }
0x10ec   :  { %v1885_v63 = vpop.xlane.xlu0 %1884 }
0x10ed   :  { %v1887_v0 = vsub.f32 %v2943_v58, %v1885_v63 }
0x10ee   :  { %v1882_v3 = vpop.xlane.xlu1 %1881 }
0x10ef   :  { %v1890_v4 = vmul.f32 1.442695, %v1887_v0  ;;  %v1886_v5 = vsub.f32 %v1871_v61, %v1882_v3 }
0x10f1   :  { %3072 = vpow2.f32 %v1890_v4  ;;  %v1888_v6 = vmul.f32 1.442695, %v1886_v5 }
0x10f3   :  { %3074 = vpow2.f32 %v1888_v6 }
0x10fe   :  { %v3073_v7 = vpop.eup %3072 }
0x10ff   :  { %v1893_v8 = vmul.f32 %v3073_v7, %v3256_v57  ;;  %v1256_v57 = vmul.f32 0.9, %v3387_v44  ;;  %v726_v7 = vmul.f32 0.9, %v3334_v14  ;;  %v3084_v14 = vld [vmem:[%s3565_s0 + $0x8] sm:$0xff] }
0x1100   :  { %v3075_v9 = vpop.eup %3074 }
0x1101   :  { %v1897_v10 = vsel %vm285_vm2, %v1893_v8, 0.0  ;;  %v1892_v11 = vmul.f32 %v3075_v9, %v3261_v59  ;;  %v1258_v59 = vadd.f32 %v1256_v57, %v3338_v18 }
0x1102   :  { %1898 = vadd.xlane.f32.xlu1 %v1897_v10  ;;  %v728_v10 = vadd.f32 %v726_v7, %v3285_v13  ;;  %v2491_v7 = vld [vmem:[%s3575_s10 + $0x8] sm:$0xff] }
0x1103   :  { %v1894_v12 = vsel %vm285_vm2, %v1892_v11, 0.0 }
0x1104   :  { %1895 = vadd.xlane.f32.xlu0 %v1894_v12 }
0x1113   :  { %1906 = vrot.lane.b32.xlu1 %v3230_v41, %s3119_s14 }
0x1117   :  { %1997 = vrot.lane.b32.xlu1 %v3269_v1, %s3119_s14 }
0x111a   :  { %1908 = vrot.lane.b32.xlu0 %v3226_v39, %s3119_s14 }
0x111b   :  { %2321 = vrot.lane.b32.xlu1 %v1257_v17, %s3120_s15 }
0x111e   :  { %1995 = vrot.lane.b32.xlu0 %v3273_v2, %s3119_s14 }
0x1122   :  { %v2936_v20 = vpop.f32.mrf.mxu0  ;;  %2323 = vrot.lane.b32.xlu0 %v1258_v59, %s3120_s15 }
0x1123   :  { %v1786_v41 = vmul.f32 0.9, %v2936_v20 }
0x1124   :  { %v1776_v42 = vpop.f32.mrf.mxu0 }
0x1125   :  { %v1788_v1 = vadd.f32 %v1786_v41, %v3391_v25  ;;  %v1785_v21 = vmul.f32 0.9, %v1776_v42 }
0x1127   :  { %v1787_v23 = vadd.f32 %v1785_v21, %v3394_v29  ;;  %2331 = vrot.lane.b32.xlu0 %v1788_v1, %s3121_s16 }
0x1129   :  { %2329 = vrot.lane.b32.xlu1 %v1787_v23, %s3121_s16 }
0x118b   :  { %v1899_v39 = vpop.xlane.xlu1 %1898 }
0x118c   :  { %v1901_v22 = vmax.f32 %v1899_v39, 1e-30 }
0x118d   :  { %v1896_v44 = vpop.xlane.xlu0 %1895 }
0x118e   :  { %v1900_v24 = vmax.f32 %v1896_v44, 1e-30  ;;  %3076 = vrcp.f32 %v1901_v22 }
0x118f   :  { %v1907_v18 = vpop.permute.xlu1 %1906 }
0x1190   :  { %3078 = vrcp.f32 %v1900_v24 }
0x1191   :  { %v1909_v2 = vpop.permute.xlu0 %1908 }
0x1192   :  { %2944 = vmatprep.subr.mxu0 %v1909_v2 }
0x1193   :  { %2945 = vmatpush3.msra.mxu0 %v1909_v2  ;;  %v1998_v31 = vpop.permute.xlu1 %1997 }
0x1194   :  { %2946 = vmatprep.subr.mxu0 %v1907_v18 }
0x1195   :  { %2947 = vmatpush3.msra.mxu0 %v1907_v18  ;;  %v1996_v35 = vpop.permute.xlu0 %1995 }
0x1197   :  { %v2322_v6 = vpop.permute.xlu1 %2321 }
0x1199   :  { %v2324_v5 = vpop.permute.xlu0 %2323 }
0x119a   :  { %v2344_v16 = vsel %vm199_vm1, %v728_v10, %v2324_v5  ;;  %v2493_v5 = vld [vmem:[%s3575_s10 + $0x18] sm:$0xff] }
0x119b   :  { %v3077_v26 = vpop.eup %3076 }
0x119c   :  { %v1905_v28 = vmul.f32 %v3077_v26, %v1893_v8  ;;  %v725_v8 = vmul.f32 0.9, %v3336_v15 }
0x119d   :  { %v3079_v25 = vpop.eup %3078  ;;  %v2332_v9 = vpop.permute.xlu0 %2331 }
0x119e   :  { %v1904_v27 = vmul.f32 %v3079_v25, %v1892_v11  ;;  %v2330_v11 = vpop.permute.xlu1 %2329  ;;  %v727_v12 = vadd.f32 %v725_v8, %v3288_v19  ;;  %v2346_v17 = vsel %vm285_vm2, %v2344_v16, %v2332_v9  ;;  %v3085_v19 = vld [vmem:[%s3565_s0] sm:$0xff] }
0x119f   :  { %v2490_v8 = vld [vmem:[%s3575_s10] sm:$0xff] }
0x11a0   :  { %2948 = vmatprep.mubr.msk.f32.mxu0 %vm285_vm2, %v1904_v27  ;;  %2962 = vmatprep.mubr.msk.f32.mxu1 %vm285_vm2, %v1904_v27  ;;  %v2343_v59 = vsel %vm199_vm1, %v727_v12, %v2322_v6  ;;  %v2492_v6 = vld [vmem:[%s3575_s10 + $0x10] sm:$0xff]  ;;  %v2670_v9 = vld [vmem:[%s3574_s9] ss:$0 sm:$0xff] }
0x11a1   :  { %2949 = vmatmul.mubr.msk.f32.vlgmr.msra.gmra.mxu0 %vm285_vm2, %v1905_v28  ;;  %v2345_v41 = vsel %vm285_vm2, %v2343_v59, %v2330_v11  ;;  %v2673_v59 = vld [vmem:[%s3576_s11] ss:$0 sm:$0xff] }
0x11a2   :  { %2955 = vmatprep.mubr.msk.f32.mxu0 %vm285_vm2, %v1904_v27 }
0x1261   :  { %v2950_v29 = vpop.f32.mrf.mxu0 }
0x1262   :  { %v1994_v30 = vmul.f32 0.9, %v2950_v29  ;;  %v2399_v29 = vld [vmem:[%s3573_s8 + $0x18] sm:$0xff] }
0x1263   :  { %v1984_v32 = vpop.f32.mrf.mxu0 }
0x1264   :  { %v2002_v33 = vadd.f32 %v1998_v31, %v1994_v30  ;;  %v1993_v34 = vmul.f32 0.9, %v1984_v32  ;;  %v2398_v30 = vld [vmem:[%s3573_s8 + $0x10] sm:$0xff]  ;;  %v2396_v32 = vld [vmem:[%s3573_s8] sm:$0xff] }
0x1266   :  { %v2001_v36 = vadd.f32 %v1996_v35, %v1993_v34  ;;  %2951 = vmatprep.subr.mxu0 %v2002_v33  ;;  %v2504_v34 = vld [vmem:[%s3575_s10 + $0x70] sm:$0xff] }
0x1267   :  { %2952 = vmatpush3.msra.mxu0 %v2002_v33  ;;  %v2505_v33 = vld [vmem:[%s3575_s10 + $0x78] sm:$0xff] }
0x1268   :  { %2953 = vmatprep.subr.mxu0 %v2001_v36 }
0x1269   :  { %2954 = vmatpush3.msra.mxu0 %v2001_v36  ;;  %v2502_v36 = vld [vmem:[%s3575_s10 + $0x60] sm:$0xff] }
0x126a   :  { %2956 = vmatmul.mubr.msk.f32.vlgmr.msra.gmra.mxu0 %vm285_vm2, %v1905_v28 }
0x126b   :  { %2969 = vmatprep.mubr.msk.f32.mxu0 %vm285_vm2, %v1904_v27 }
0x132a   :  { %v2957_v37 = vpop.f32.mrf.mxu0 }
0x132b   :  { %v2079_v38 = vmul.f32 0.9, %v2957_v37  ;;  %v2501_v37 = vld [vmem:[%s3575_s10 + $0x58] sm:$0xff] }
0x132c   :  { %v2069_v40 = vpop.f32.mrf.mxu0 }
0x132d   :  { %v2081_v43 = vadd.f32 %v2079_v38, %v1998_v31  ;;  %v2078_v45 = vmul.f32 0.9, %v2069_v40  ;;  %v2500_v38 = vld [vmem:[%s3575_s10 + $0x50] sm:$0xff]  ;;  %v2499_v40 = vld [vmem:[%s3575_s10 + $0x48] sm:$0xff] }
0x132f   :  { %v2080_v46 = vadd.f32 %v2078_v45, %v1996_v35  ;;  %2958 = vmatprep.subr.mxu1 %v2081_v43  ;;  %v2497_v45 = vld [vmem:[%s3575_s10 + $0x38] sm:$0xff] }
0x1330   :  { %2959 = vmatpush3.msra.mxu1 %v2081_v43  ;;  %v2498_v43 = vld [vmem:[%s3575_s10 + $0x40] sm:$0xff] }
0x1331   :  { %2960 = vmatprep.subr.mxu1 %v2080_v46 }
0x1332   :  { %2961 = vmatpush3.msra.mxu1 %v2080_v46  ;;  %v2496_v46 = vld [vmem:[%s3575_s10 + $0x30] sm:$0xff] }
0x1333   :  { %2963 = vmatmul.mubr.msk.f32.vlgmr.msra.gmra.mxu1 %vm285_vm2, %v1905_v28 }
0x1334   :  { %2976 = vmatprep.mubr.msk.f32.mxu1 %vm285_vm2, %v1904_v27 }
0x13f3   :  { %v2964_v47 = vpop.f32.mrf.mxu1 }
0x13f4   :  { %v2158_v48 = vmul.f32 0.9, %v2964_v47  ;;  %v2495_v47 = vld [vmem:[%s3575_s10 + $0x28] sm:$0xff] }
0x13f5   :  { %v2148_v49 = vpop.f32.mrf.mxu1 }
0x13f6   :  { %v2160_v50 = vadd.f32 %v2158_v48, %v1998_v31  ;;  %v2157_v51 = vmul.f32 0.9, %v2148_v49  ;;  %v2494_v48 = vld [vmem:[%s3575_s10 + $0x20] sm:$0xff] }
0x13f8   :  { %v2159_v52 = vadd.f32 %v2157_v51, %v1996_v35  ;;  %2965 = vmatprep.subr.mxu0 %v2160_v50 }
0x13f9   :  { %2966 = vmatpush3.msra.mxu0 %v2160_v50 }
0x13fa   :  { %2967 = vmatprep.subr.mxu0 %v2159_v52 }
0x13fb   :  { %2968 = vmatpush3.msra.mxu0 %v2159_v52 }
0x13fc   :  { %2970 = vmatmul.mubr.msk.f32.vlgmr.msra.gmra.mxu0 %vm285_vm2, %v1905_v28  ;;  %2979 = vmatprep.subr.mxu0 %v2399_v29 }
0x13fd   :  { %2980 = vmatpush3.msra.mxu0 %v2399_v29 }
0x13fe   :  { %2981 = vmatprep.subr.mxu0 %v2398_v30 }
0x13ff   :  { %2982 = vmatpush3.msra.mxu0 %v2398_v30 }
0x14bc   :  { %v2971_v53 = vpop.f32.mrf.mxu0 }
0x14bd   :  { %v2237_v54 = vmul.f32 0.9, %v2971_v53 }
0x14be   :  { %v2227_v55 = vpop.f32.mrf.mxu0 }
0x14bf   :  { %v2239_v56 = vadd.f32 %v2237_v54, %v1998_v31  ;;  %v2236_v58 = vmul.f32 0.9, %v2227_v55 }
0x14c1   :  { %v2238_v60 = vadd.f32 %v2236_v58, %v1996_v35  ;;  %2972 = vmatprep.subr.mxu1 %v2239_v56  ;;  %v2668_v58 = vld [vmem:[%s3571_s6] ss:$0 sm:$0xff] }
0x14c2   :  { %2973 = vmatpush3.msra.mxu1 %v2239_v56 }
0x14c3   :  { %2974 = vmatprep.subr.mxu1 %v2238_v60 }
0x14c4   :  { %2975 = vmatpush3.msra.mxu1 %v2238_v60 }
0x14c5   :  { %2977 = vmatmul.mubr.msk.f32.vlgmr.msra.gmra.mxu1 %vm285_vm2, %v1905_v28  ;;  %2990 = vmatprep.subr.mxu1 %v2505_v33 }
0x14c6   :  { %2991 = vmatpush3.msra.mxu1 %v2505_v33 }
0x14c7   :  { %2992 = vmatprep.subr.mxu1 %v2504_v34 }
0x14c8   :  { %2993 = vmatpush3.msra.mxu1 %v2504_v34 }
0x1585   :  { %v2978_v61 = vpop.f32.mrf.mxu1 }
0x1586   :  { %v2316_v62 = vmul.f32 0.9, %v2978_v61 }
0x1587   :  { %v2306_v63 = vpop.f32.mrf.mxu1 }
0x1588   :  { %v2318_v0 = vadd.f32 %v2316_v62, %v1998_v31  ;;  %v2315_v3 = vmul.f32 0.9, %v2306_v63  ;;  %v2397_v31 = vld [vmem:[%s3573_s8 + $0x8] sm:$0xff] }
0x1589   :  { %2983 = vmatprep.subr.mxu0 %v2397_v31 }
0x158a   :  { %v2317_v4 = vadd.f32 %v2315_v3, %v1996_v35  ;;  %2339 = vrot.lane.b32.xlu0 %v2318_v0, %s3122_s17  ;;  %2984 = vmatpush3.msra.mxu0 %v2397_v31  ;;  %v2503_v35 = vld [vmem:[%s3575_s10 + $0x68] sm:$0xff]  ;;  %v2669_v0 = vld [vmem:[%s3572_s7] ss:$0 sm:$0xff]  ;;  %s3123_s10 = smov [#allocation2]  }
0x158b   :  { %2985 = vmatprep.subr.mxu0 %v2396_v32  ;;  %2994 = vmatprep.subr.mxu1 %v2503_v35  ;;  %s2597_s19 = sshll.u32 %s3123_s10, 4  ;;  %s2598_s19 = int_to_ptr.vmem [resolvable:$true] %s2597_s19 }
0x158c   :  { %2337 = vrot.lane.b32.xlu1 %v2317_v4, %s3122_s17  ;;  %2986 = vmatpush3.msra.mxu0 %v2396_v32  ;;  %s3086_s9 = scalar_lea.vmem %s2598_s19, 256  ;;  %p3091_p1 = scmp.lt.s32.totalorder %s2598_s19, %s2598_s19 }
0x158d   :  { %2995 = vmatpush3.msra.mxu1 %v2503_v35  ;;  %p3087_p0 = scmp.ne.s32.totalorder %s2598_s19, %s3086_s9  ;;  %p3092_p2 = scmp.lt.s32.totalorder %s3086_s9, %s3086_s9 }
0x158e   :  { %2996 = vmatprep.subr.mxu1 %v2502_v36 }
0x158f   :  { %2997 = vmatpush3.msra.mxu1 %v2502_v36  ;;  %p3093_p3 = por %p3092_p2, %p3091_p1 }
0x1590   :  { %2998 = vmatprep.subr.mxu1 %v2501_v37 }
0x1591   :  { %2999 = vmatpush3.msra.mxu1 %v2501_v37  ;;  %p3094_p4 = pnand %p3093_p3, %p3087_p0 }
0x1592   :  { %3000 = vmatprep.subr.mxu1 %v2500_v38 }
0x1593   :  { %3001 = vmatpush3.msra.mxu1 %v2500_v38 }
0x1594   :  { %3002 = vmatprep.subr.mxu1 %v2499_v40 }
0x1595   :  { %3003 = vmatpush3.msra.mxu1 %v2499_v40 }
0x1596   :  { %3004 = vmatprep.subr.mxu1 %v2498_v43 }
0x1597   :  { %3005 = vmatpush3.msra.mxu1 %v2498_v43 }
0x1598   :  { %3006 = vmatprep.subr.mxu1 %v2497_v45 }
0x1599   :  { %3007 = vmatpush3.msra.mxu1 %v2497_v45 }
0x159a   :  { %3008 = vmatprep.subr.mxu1 %v2496_v46 }
0x159b   :  { %3009 = vmatpush3.msra.mxu1 %v2496_v46 }
0x159c   :  { %3010 = vmatprep.subr.mxu1 %v2495_v47 }
0x159d   :  { %3011 = vmatpush3.msra.mxu1 %v2495_v47 }
0x159e   :  { %3012 = vmatprep.subr.mxu1 %v2494_v48 }
0x159f   :  { %3013 = vmatpush3.msra.mxu1 %v2494_v48 }
0x15a0   :  { %3014 = vmatprep.subr.mxu1 %v2493_v5 }
0x15a1   :  { %3015 = vmatpush3.msra.mxu1 %v2493_v5 }
0x15a2   :  { %3016 = vmatprep.subr.mxu1 %v2492_v6 }
0x15a3   :  { %3017 = vmatpush3.msra.mxu1 %v2492_v6 }
0x15a4   :  { %3018 = vmatprep.subr.mxu1 %v2491_v7 }
0x15a5   :  { %3019 = vmatpush3.msra.mxu1 %v2491_v7 }
0x15a6   :  { %3020 = vmatprep.subr.mxu1 %v2490_v8 }
0x15a7   :  { %3021 = vmatpush3.msra.mxu1 %v2490_v8 }
0x15fc   :  { %v2340_v57 = vpop.permute.xlu0 %2339 }
0x15fd   :  { %v2349_v20 = vsel %vm2347_vm3, %v2346_v17, %v2340_v57 }
0x15fe   :  { %v3458_v15 = vadd.f32 %v3084_v14, %v2349_v20  ;;  %v2338_v13 = vpop.permute.xlu1 %2337 }
0x15ff   :  { %v2348_v42 = vsel %vm2347_vm3, %v2345_v41, %v2338_v13 }
0x1600   :  { %v3463_v1 = vadd.f32 %v3085_v19, %v2348_v42  ;;  %v2355_v21 = vsel %vm48_vm0, %v3458_v15, 0.0 }
0x1601   :  { %2356 = vadd.xlane.f32.xlu0 %v2355_v21 }
0x1602   :  { %v2352_v23 = vsel %vm48_vm0, %v3463_v1, 0.0 }
0x1603   :  { %2353 = vadd.xlane.f32.xlu1 %v2352_v23 }
0x168a   :  { %v2357_v39 = vpop.xlane.xlu0 %2356 }
0x168b   :  { %v2359_v22 = vmul.f32 0.03125, %v2357_v39 }
0x168c   :  { %v2354_v44 = vpop.xlane.xlu1 %2353 }
0x168d   :  { %v3470_v24 = vsub.f32 %v3458_v15, %v2359_v22  ;;  %v2358_v2 = vmul.f32 0.03125, %v2354_v44 }
0x168f   :  { %v3473_v18 = vsub.f32 %v3463_v1, %v2358_v2  ;;  %v2363_v26 = vmul.f32 %v3470_v24, %v3470_v24 }
0x1691   :  { %v2367_v25 = vsel %vm48_vm0, %v2363_v26, 0.0  ;;  %v2362_v27 = vmul.f32 %v3473_v18, %v3473_v18 }
0x1692   :  { %2368 = vadd.xlane.f32.xlu1 %v2367_v25 }
0x1693   :  { %v2364_v28 = vsel %vm48_vm0, %v2362_v27, 0.0 }
0x1694   :  { %2365 = vadd.xlane.f32.xlu0 %v2364_v28 }
0x171b   :  { %v2369_v49 = vpop.xlane.xlu1 %2368 }
0x171c   :  { %v2371_v50 = vmul.f32 0.03125, %v2369_v49 }
0x171d   :  { %v2366_v51 = vpop.xlane.xlu0 %2365 }
0x171e   :  { %v2373_v52 = vadd.f32 1e-05, %v2371_v50  ;;  %v2370_v53 = vmul.f32 0.03125, %v2366_v51 }
0x1720   :  { %3080 = vrsqrt.f32 %v2373_v52  ;;  %v2372_v54 = vadd.f32 1e-05, %v2370_v53 }
0x1722   :  { %3082 = vrsqrt.f32 %v2372_v54 }
0x172d   :  { %v3081_v55 = vpop.eup %3080 }
0x172e   :  { %v2377_v56 = vmul.f32 %v3081_v55, %v3470_v24 }
0x172f   :  { %v3083_v60 = vpop.eup %3082 }
0x1730   :  { %v2376_v61 = vmul.f32 %v3083_v60, %v3473_v18  ;;  %v2386_v62 = vmul.f32 %v2668_v58, %v2377_v56 }
0x1732   :  { %v2385_v63 = vmul.f32 %v2668_v58, %v2376_v61  ;;  %v2395_v4 = vadd.f32 %v2669_v0, %v2386_v62 }
0x1734   :  { %v2394_v3 = vadd.f32 %v2669_v0, %v2385_v63 }
0x1736   :  { %2987 = vmatprep.mubr.msk.f32.mxu0 %vm48_vm0, %v2394_v3 }
0x1737   :  { %2988 = vmatmul.mubr.msk.f32.vlgmr.msra.gmra.mxu0 %vm48_vm0, %v2395_v4 }
0x17f7   :  { %v2989_v10 = vpop.f32.mrf.mxu0 }
0x17f8   :  { %v2485_v11 = vadd.f32 %v2989_v10, %v2670_v9 }
0x17f9   :  { %v2479_v12 = vpop.f32.mrf.mxu0 }
0x17fa   :  { %v2480_v16 = vadd.f32 %v2670_v9, %v2479_v12  ;;  %v2489_v57 = vmax.f32 %v2485_v11, 0.0 }
0x17fc   :  { %v2488_v17 = vmax.f32 %v2480_v16, 0.0 }
0x17fe   :  { %3022 = vmatprep.mubr.f32.mxu1 %v2488_v17 }
0x17ff   :  { %3023 = vmatmul.mubr.f32.vlgmr.msra.gmra.mxu1 %v2489_v57 }
0x18bf   :  { %v3024_v20 = vpop.f32.mrf.mxu1 }
0x18c0   :  { %v2585_v41 = vadd.f32 %v3024_v20, %v2673_v59 }
0x18c1   :  { %v2579_v14 = vpop.f32.mrf.mxu1 }
0x18c2   :  { %v2589_v13 = vadd.f32 %v2585_v41, %v3458_v15  ;;  %v2580_v42 = vadd.f32 %v2673_v59, %v2579_v14 }
0x18c4   :  { %2591 = vst.msk [vmem:[#allocation2 + $0x8] sm:$0xff] %vm48_vm0, %v2589_v13  ;;  %v2588_v19 = vadd.f32 %v2580_v42, %v3463_v1 }
0x18c6   :  { %2590 = vst.msk [vmem:[#allocation2] sm:$0xff] %vm48_vm0, %v2588_v19 }
0x18c7   :  { %3097 = shalt.err (!%p3094_p4)
}
0x18c8   :  { %s3124_s11 = smov 128  }
0x18c9   :  { %2603 = dma.vmem_to_hbm [thread:$0]  %s2598_s19, 256, %s3577_s12, [#allocation3], %s3124_s11, %s3124_s11, %s3120_s15  }
0x18ca   :  { %3106 = dma.done.wait [#allocation3], 256  }
0x18cb   :  { %3107 = vsyncadd [#allocation3], 4294967040 }
0x18cc   :  { %2607 = vsyncpa [#allocation3], 1 }

</bundles_post_ra>
